<compile_context>
chip_gen: v5e
topology: v5e:2x2
jax: 0.10.0
libtpu: 0.0.40
codegen_flags: <defaults>
</compile_context>

<pallas_src>
import jax
import jax.numpy as jnp
from jax.experimental import pallas as pl
from jax.experimental.pallas import tpu as pltpu


def probing_pair_kernel(spans_ref,            # VMEM [TB, 1, 2] int32  (start, end)
                        x_ref,                # VMEM [TB*S, Din]
                        w1_ref, b1_ref,       # VMEM [Din, Hp], [1, Hp]
                        w2_ref, b2_ref,       # VMEM [Hp, Hp],  [1, Hp]
                        wp_ref, bp_ref,       # VMEM [Hp, Cp],  [1, Cp]
                        out_ref):             # VMEM [TB, Cp]
    TB = spans_ref.shape[0]
    R = x_ref.shape[0]                        # R = TB * S
    S = R // TB
    H = w1_ref.shape[1]

    # --- subject model: 2-layer MLP with the batch folded into M (TB*S rows) ----------
    h1 = jnp.dot(x_ref[...], w1_ref[...], preferred_element_type=jnp.float32) + b1_ref[...]
    h1 = jnp.maximum(h1, 0.0)                                        # ReLU (f32, VPU)
    h2 = jnp.dot(h1.astype(w2_ref.dtype), w2_ref[...],
                 preferred_element_type=jnp.float32) + b2_ref[...]   # [TB*S, H] f32

    # --- pooler: span mean as VPU mask + sublane (XLU) sum, scaled on the EUP ----------
    sp = spans_ref[...]                                              # [TB, 1, 2] int32
    starts = sp[:, :, 0:1]                                           # [TB, 1, 1]
    ends = sp[:, :, 1:2]                                             # [TB, 1, 1]
    pos = jax.lax.broadcasted_iota(jnp.int32, (S, 1), 0)             # [S, 1] token index
    inv_count = pl.reciprocal(
        jnp.maximum((ends - starts).astype(jnp.float32), 1.0), approx=True)   # [TB, 1, 1]
    in_span = jnp.logical_and(pos >= starts, pos < ends)             # [TB, S, 1]
    wmask = jnp.where(in_span, inv_count, 0.0)                       # 1/count inside span
    pooled = jnp.sum(h2.reshape(TB, S, H) * wmask, axis=1)           # [TB, H] f32

    # --- probe: one (TB, H) x (H, Cp) matmul, lane-dense output block ------------------
    logits = jnp.dot(pooled.astype(wp_ref.dtype), wp_ref[...],
                     preferred_element_type=jnp.float32) + bp_ref[...]
    out_ref[...] = logits.astype(out_ref.dtype)


def _round_up(n, m):
    return ((n + m - 1) // m) * m


def _choose_tb(S, B):
    # Target ~512 encoder rows (M = TB*S) per grid step so the MXU stays fed and the
    # per-step overhead is amortised; keep TB a sublane multiple of 8.
    tb = _round_up(max(1, -(-512 // S)), 8)
    # For small batches, don't inflate padding: cap TB near half the (rounded) batch so
    # there are still >= 2 grid steps of real work for v7x's two TensorCores.
    tb = max(8, min(tb, _round_up(max(1, -(-B // 2)), 8)))
    return tb


def _pad2(a, rows, cols):
    r, c = a.shape
    return jnp.pad(a, ((0, rows - r), (0, cols - c)))


def probing_pair_forward(x, target_spans, params, *, use_bf16=True):
    """x: [B, S, Din] f32; target_spans: [B, 2] int (start, end) -> logits [B, C] f32.

    use_bf16 (default True): store x and weight matrices in bf16 for the MXU (f32
    accumulation, f32 bias/ReLU/pooling). Set False for an exact f32 reference path.
    """
    B, S, Din = x.shape
    w1, b1, w2, b2, wp, bp = params
    H = w1.shape[1]
    C = wp.shape[1]

    TB = _choose_tb(S, B)
    # >= 2 grid steps so dimension_semantics=("parallel",) can shard across v7x's 2 TCs.
    B_pad = _round_up(max(B, 2 * TB), TB)
    H_pad = _round_up(H, 128)
    C_pad = _round_up(C, 128)
    # Din is intentionally left unpadded: zero-padding K doesn't speed the MXU pass but
    # multiplies the x DMA bytes and VMEM tile size.

    mm_dtype = jnp.bfloat16 if use_bf16 else jnp.float32

    # --- host-side padding / layout ------------------------------------------------------
    spans_p = target_spans.astype(jnp.int32)
    x_p = x
    if B_pad != B:
        x_p = jnp.pad(x_p, ((0, B_pad - B), (0, 0), (0, 0)))
        # padded rows: start = end = 0 -> empty span -> zero pooled; logits sliced off
        spans_p = jnp.pad(spans_p, ((0, B_pad - B), (0, 0)))
    # 2-D row-major x so each grid block is a plain sublane-dense 2-D tile (no in-kernel
    # reshape of the input); spans as [B_pad, 1, 2] so scalars arrive natively 3-D.
    x2d = x_p.reshape(B_pad * S, Din).astype(mm_dtype)
    spans3 = spans_p.reshape(B_pad, 1, 2)

    w1p = _pad2(w1, Din, H_pad).astype(mm_dtype)
    w2p = _pad2(w2, H_pad, H_pad).astype(mm_dtype)
    wpp = _pad2(wp, H_pad, C_pad).astype(mm_dtype)
    b1p = _pad2(b1, 1, H_pad).astype(jnp.float32)     # biases stay f32 (added post-accum)
    b2p = _pad2(b2, 1, H_pad).astype(jnp.float32)
    bpp = _pad2(bp, 1, C_pad).astype(jnp.float32)

    grid = (B_pad // TB,)

    # --- advisory cost estimate for the XLA scheduler ------------------------------------
    rows = B_pad * S
    flops = (2 * rows * Din * H_pad            # encoder layer 1
             + 2 * rows * H_pad * H_pad        # encoder layer 2
             + 3 * rows * H_pad                # mask multiply + sublane-sum pooling
             + 2 * B_pad * H_pad * C_pad)      # probe
    weights_nbytes = sum(int(a.nbytes) for a in (w1p, b1p, w2p, b2p, wpp, bpp))
    bytes_accessed = (int(x2d.nbytes) + int(spans3.nbytes) + weights_nbytes
                      + B_pad * C_pad * 4)
    cost = pl.CostEstimate(flops=int(flops), transcendentals=int(B_pad),
                           bytes_accessed=int(bytes_accessed))

    # --- VMEM budget: count resident blocks once, cap against this generation's VMEM ----
    def _nbytes(shape, dtype):
        n = 1
        for d in shape:
            n *= d
        return n * jnp.dtype(dtype).itemsize

    io_bytes = 2 * (_nbytes((TB * S, Din), mm_dtype)        # x block (double-buffered)
                    + _nbytes((TB, 1, 2), jnp.int32)        # spans block
                    + _nbytes((TB, C_pad), jnp.float32))    # out block
    interm_bytes = (2 * _nbytes((TB * S, H_pad), jnp.float32)   # h1, h2
                    + _nbytes((TB, S, H_pad), jnp.float32)      # pooling temp
                    + _nbytes((TB, H_pad), jnp.float32)
                    + _nbytes((TB, C_pad), jnp.float32))
    # weights counted at 2x as an upper bound (in case single-buffering is unavailable)
    vmem_needed = 2 * weights_nbytes + io_bytes + interm_bytes
    try:
        vmem_cap = int(pltpu.get_tpu_info().vmem_capacity_bytes)
    except Exception:
        vmem_cap = 64 << 20   # conservative fallback: v7x physical VMEM per TensorCore
    vmem_limit = int(min(max(vmem_needed + vmem_needed // 2, 16 << 20),
                         (vmem_cap * 3) // 4))
    # TODO(synk): for real subject models (H_pad >= 1024) add a K-tiled ("arbitrary")
    # reduction grid axis over H for w2/wp instead of full-extent weight blocks, so the
    # kernel stays within v7x's 64 MiB VMEM without shrinking TB.

    def build_call(weight_pipeline_mode):
        def wspec(shape):
            kwargs = {}
            if weight_pipeline_mode is not None:
                kwargs["pipeline_mode"] = weight_pipeline_mode
            return pl.BlockSpec(shape, lambda i: (0,) * len(shape), **kwargs)

        grid_spec = pltpu.PrefetchScalarGridSpec(
            num_scalar_prefetch=0,
            grid=grid,
            in_specs=[
                pl.BlockSpec((TB, 1, 2), lambda i: (i, 0, 0)),     # spans
                pl.BlockSpec((TB * S, Din), lambda i: (i, 0)),     # x (2-D slab)
                wspec((Din, H_pad)),                               # w1
                wspec((1, H_pad)),                                 # b1
                wspec((H_pad, H_pad)),                             # w2
                wspec((1, H_pad)),                                 # b2
                wspec((H_pad, C_pad)),                             # wp
                wspec((1, C_pad)),                                 # bp
            ],
            out_specs=pl.BlockSpec((TB, C_pad), lambda i: (i, 0)),
        )
        return pl.pallas_call(
            probing_pair_kernel,
            out_shape=jax.ShapeDtypeStruct((B_pad, C_pad), jnp.float32),
            grid_spec=grid_spec,
            compiler_params=pltpu.CompilerParams(
                dimension_semantics=("parallel",),   # shard steps across v7x's 2 TCs
                vmem_limit_bytes=vmem_limit),
            cost_estimate=cost,
        )

    args = (spans3, x2d, w1p, b1p, w2p, b2p, wpp, bpp)
    try:
        # Weights/biases have constant index maps -> request single buffering (halves
        # their resident VMEM; matters once the subject model is a real transformer).
        out_padded = build_call(pl.Buffered(1))(*args)
    except Exception:
        # Graceful fallback if this JAX build rejects pipeline_mode on pallas_call.
        out_padded = build_call(None)(*args)

    return out_padded[:B, :C]


def reference_forward(x, target_spans, params):
    """Pure-JAX reference mirroring PyTorch ProbingPair.forward semantics."""
    w1, b1, w2, b2, wp, bp = params
    h1 = jnp.maximum(jnp.einsum("bsd,dh->bsh", x, w1) + b1, 0.0)
    h2 = jnp.einsum("bsh,hk->bsk", h1, w2) + b2                      # subject
    S = x.shape[1]
    pos = jnp.arange(S)[None, :]                                     # [1, S]
    start = target_spans[:, 0:1]
    end = target_spans[:, 1:2]
    mask = ((pos >= start) & (pos < end)).astype(jnp.float32)        # [B, S]
    count = jnp.maximum((end - start).astype(jnp.float32), 1.0)      # [B, 1]
    pooled = jnp.einsum("bs,bsh->bh", mask, h2) / count              # pooler
    return pooled @ wp + bp                                          # probe


if __name__ == "__main__":
    B, S, Din, H, C = 2, 8, 32, 32, 4

    key = jax.random.PRNGKey(0)
    k_x, k_w1, k_b1, k_w2, k_b2, k_wp, k_bp = jax.random.split(key, 7)

    x = jax.random.normal(k_x, (B, S, Din), dtype=jnp.float32)
    # target spans (start inclusive, end exclusive), deterministic
    target_spans = jnp.array([[1, 4], [2, 7]], dtype=jnp.int32)

    # deterministic synthetic parameters (subject is "frozen": just constants here)
    w1 = jax.random.normal(k_w1, (Din, H), dtype=jnp.float32) * 0.1
    b1 = jax.random.normal(k_b1, (1, H), dtype=jnp.float32) * 0.1
    w2 = jax.random.normal(k_w2, (H, H), dtype=jnp.float32) * 0.1
    b2 = jax.random.normal(k_b2, (1, H), dtype=jnp.float32) * 0.1
    wp = jax.random.normal(k_wp, (H, C), dtype=jnp.float32) * 0.1
    bp = jax.random.normal(k_bp, (1, C), dtype=jnp.float32) * 0.1
    params = (w1, b1, w2, b2, wp, bp)

    ref = reference_forward(x, target_spans, params)

    # default path: bf16 MXU storage, f32 accumulation
    out = jax.block_until_ready(probing_pair_forward(x, target_spans, params))
    assert out.shape == (B, C)
    assert jnp.allclose(out, ref, atol=3e-2, rtol=3e-2), (out, ref)

    # exact f32 path (tighter tolerance; only the EUP approx-reciprocal differs)
    out32 = jax.block_until_ready(
        probing_pair_forward(x, target_spans, params, use_bf16=False))
    assert jnp.allclose(out32, ref, atol=5e-3, rtol=5e-3), (out32, ref)

    print("KERNEL_OK")
</pallas_src>

<mosaic_0001>
module attributes {stable_mosaic.version = 11 : i64} {
  func.func @probing_pair_kernel(%arg0: i32, %arg1: memref<8x1x2xi32, #tpu.memory_space<vmem>>, %arg2: memref<64x32xbf16, #tpu.memory_space<vmem>>, %arg3: memref<32x128xbf16, #tpu.memory_space<vmem>>, %arg4: memref<1x128xf32, #tpu.memory_space<vmem>>, %arg5: memref<128x128xbf16, #tpu.memory_space<vmem>>, %arg6: memref<1x128xf32, #tpu.memory_space<vmem>>, %arg7: memref<128x128xbf16, #tpu.memory_space<vmem>>, %arg8: memref<1x128xf32, #tpu.memory_space<vmem>>, %arg9: memref<8x128xf32, #tpu.memory_space<vmem>>) attributes {dimension_semantics = [#tpu.dimension_semantics<parallel>], iteration_bounds = array<i64: 2>, scalar_prefetch = 0 : i64, scratch_operands = 0 : i64, tpu.core_type = #tpu.core_type<tc>, window_params = [{transform_indices = @transform_0, window_bounds = array<i64: 8, 1, 2>}, {transform_indices = @transform_1, window_bounds = array<i64: 64, 32>}, {pipeline_mode = #tpu.pipeline_mode<synchronous>, transform_indices = @transform_2, window_bounds = array<i64: 32, 128>}, {pipeline_mode = #tpu.pipeline_mode<synchronous>, transform_indices = @transform_3, window_bounds = array<i64: 1, 128>}, {pipeline_mode = #tpu.pipeline_mode<synchronous>, transform_indices = @transform_4, window_bounds = array<i64: 128, 128>}, {pipeline_mode = #tpu.pipeline_mode<synchronous>, transform_indices = @transform_5, window_bounds = array<i64: 1, 128>}, {pipeline_mode = #tpu.pipeline_mode<synchronous>, transform_indices = @transform_6, window_bounds = array<i64: 128, 128>}, {pipeline_mode = #tpu.pipeline_mode<synchronous>, transform_indices = @transform_7, window_bounds = array<i64: 1, 128>}, {transform_indices = @transform_8, window_bounds = array<i64: 8, 128>}]} {
    %c0 = arith.constant 0 : index
    %c0_0 = arith.constant 0 : index
    %0 = vector.load %arg2[%c0, %c0_0] : memref<64x32xbf16, #tpu.memory_space<vmem>>, vector<64x32xbf16>
    %c0_1 = arith.constant 0 : index
    %c0_2 = arith.constant 0 : index
    %1 = vector.load %arg3[%c0_1, %c0_2] : memref<32x128xbf16, #tpu.memory_space<vmem>>, vector<32x128xbf16>
    %cst = arith.constant dense<0.000000e+00> : vector<64x128xf32>
    %2 = tpu.matmul %0, %1, %cst {dimension_numbers = #tpu.dot_dimension_numbers<[1], [0], [0], [1], [0, 0, 1, 1], [], []>} : vector<64x32xbf16>, vector<32x128xbf16>, vector<64x128xf32> -> vector<64x128xf32>
    %c0_3 = arith.constant 0 : index
    %c0_4 = arith.constant 0 : index
    %3 = vector.load %arg4[%c0_3, %c0_4] : memref<1x128xf32, #tpu.memory_space<vmem>>, vector<1x128xf32>
    %4 = vector.broadcast %3 : vector<1x128xf32> to vector<64x128xf32>
    %5 = arith.addf %2, %4 : vector<64x128xf32>
    %cst_5 = arith.constant 0.000000e+00 : f32
    %6 = vector.broadcast %cst_5 : f32 to vector<64x128xf32>
    %7 = arith.maximumf %5, %6 : vector<64x128xf32>
    %8 = arith.truncf %7 : vector<64x128xf32> to vector<64x128xbf16>
    %c0_6 = arith.constant 0 : index
    %c0_7 = arith.constant 0 : index
    %9 = vector.load %arg5[%c0_6, %c0_7] : memref<128x128xbf16, #tpu.memory_space<vmem>>, vector<128x128xbf16>
    %cst_8 = arith.constant dense<0.000000e+00> : vector<64x128xf32>
    %10 = tpu.matmul %8, %9, %cst_8 {dimension_numbers = #tpu.dot_dimension_numbers<[1], [0], [0], [1], [0, 0, 1, 1], [], []>} : vector<64x128xbf16>, vector<128x128xbf16>, vector<64x128xf32> -> vector<64x128xf32>
    %c0_9 = arith.constant 0 : index
    %c0_10 = arith.constant 0 : index
    %11 = vector.load %arg6[%c0_9, %c0_10] : memref<1x128xf32, #tpu.memory_space<vmem>>, vector<1x128xf32>
    %12 = vector.broadcast %11 : vector<1x128xf32> to vector<64x128xf32>
    %13 = arith.addf %10, %12 : vector<64x128xf32>
    %c0_11 = arith.constant 0 : index
    %c0_12 = arith.constant 0 : index
    %c0_13 = arith.constant 0 : index
    %14 = vector.load %arg1[%c0_11, %c0_12, %c0_13] : memref<8x1x2xi32, #tpu.memory_space<vmem>>, vector<8x1x2xi32>
    %15 = vector.extract_strided_slice %14 {offsets = [0, 0, 0], sizes = [8, 1, 1], strides = [1, 1, 1]} : vector<8x1x2xi32> to vector<8x1x1xi32>
    %16 = vector.extract_strided_slice %14 {offsets = [0, 0, 1], sizes = [8, 1, 1], strides = [1, 1, 1]} : vector<8x1x2xi32> to vector<8x1x1xi32>
    %17 = tpu.iota {dimensions = array<i32: 0>} : vector<8x1xi32>
    %18 = arith.subi %16, %15 : vector<8x1x1xi32>
    %19 = arith.sitofp %18 : vector<8x1x1xi32> to vector<8x1x1xf32>
    %cst_14 = arith.constant 1.000000e+00 : f32
    %20 = vector.broadcast %cst_14 : f32 to vector<8x1x1xf32>
    %21 = arith.maximumf %19, %20 : vector<8x1x1xf32>
    %22 = tpu.reciprocal %21 {approx = true} : vector<8x1x1xf32> -> vector<8x1x1xf32>
    %23 = vector.shape_cast %17 : vector<8x1xi32> to vector<1x8x1xi32>
    %24 = vector.broadcast %23 : vector<1x8x1xi32> to vector<8x8x1xi32>
    %25 = vector.broadcast %15 : vector<8x1x1xi32> to vector<8x8x1xi32>
    %26 = arith.cmpi sge, %24, %25 : vector<8x8x1xi32>
    %27 = vector.shape_cast %17 : vector<8x1xi32> to vector<1x8x1xi32>
    %28 = vector.broadcast %27 : vector<1x8x1xi32> to vector<8x8x1xi32>
    %29 = vector.broadcast %16 : vector<8x1x1xi32> to vector<8x8x1xi32>
    %30 = arith.cmpi slt, %28, %29 : vector<8x8x1xi32>
    %31 = arith.andi %26, %30 : vector<8x8x1xi1>
    %cst_15 = arith.constant 0.000000e+00 : f32
    %32 = vector.shape_cast %22 : vector<8x1x1xf32> to vector<8x1x1xf32>
    %33 = vector.broadcast %32 : vector<8x1x1xf32> to vector<8x8x1xf32>
    %34 = vector.broadcast %cst_15 : f32 to vector<8x8x1xf32>
    %35 = arith.select %31, %33, %34 : vector<8x8x1xi1>, vector<8x8x1xf32>
    %36 = vector.shape_cast %13 : vector<64x128xf32> to vector<8x8x128xf32>
    %37 = vector.broadcast %35 : vector<8x8x1xf32> to vector<8x8x128xf32>
    %38 = arith.mulf %36, %37 : vector<8x8x128xf32>
    %cst_16 = arith.constant dense<0.000000e+00> : vector<8x128xf32>
    %39 = vector.multi_reduction <add>, %38, %cst_16 [1] : vector<8x8x128xf32> to vector<8x128xf32>
    %40 = arith.truncf %39 : vector<8x128xf32> to vector<8x128xbf16>
    %c0_17 = arith.constant 0 : index
    %c0_18 = arith.constant 0 : index
    %41 = vector.load %arg7[%c0_17, %c0_18] : memref<128x128xbf16, #tpu.memory_space<vmem>>, vector<128x128xbf16>
    %cst_19 = arith.constant dense<0.000000e+00> : vector<8x128xf32>
    %42 = tpu.matmul %40, %41, %cst_19 {dimension_numbers = #tpu.dot_dimension_numbers<[1], [0], [0], [1], [0, 0, 1, 1], [], []>} : vector<8x128xbf16>, vector<128x128xbf16>, vector<8x128xf32> -> vector<8x128xf32>
    %c0_20 = arith.constant 0 : index
    %c0_21 = arith.constant 0 : index
    %43 = vector.load %arg8[%c0_20, %c0_21] : memref<1x128xf32, #tpu.memory_space<vmem>>, vector<1x128xf32>
    %44 = vector.broadcast %43 : vector<1x128xf32> to vector<8x128xf32>
    %45 = arith.addf %42, %44 : vector<8x128xf32>
    %c0_22 = arith.constant 0 : index
    %c0_23 = arith.constant 0 : index
    %46 = vector.load %arg9[%c0_22, %c0_23] : memref<8x128xf32, #tpu.memory_space<vmem>>, vector<8x128xf32>
    tpu.vector_store %arg9[%c0_22, %c0_23], %45 {strides = array<i32>} : memref<8x128xf32, #tpu.memory_space<vmem>>, vector<8x128xf32>,
    return
  }
  func.func @transform_0(%arg0: i32) -> (i32, i32, i32) {
    %c0_i32 = arith.constant 0 : i32
    %c0_i32_0 = arith.constant 0 : i32
    %c0_i32_1 = arith.constant 0 : i32
    return %arg0, %c0_i32, %c0_i32_0 : i32, i32, i32
  }
  func.func @transform_1(%arg0: i32) -> (i32, i32) {
    %c0_i32 = arith.constant 0 : i32
    %c0_i32_0 = arith.constant 0 : i32
    return %arg0, %c0_i32 : i32, i32
  }
  func.func @transform_2(%arg0: i32) -> (i32, i32) {
    %c0_i32 = arith.constant 0 : i32
    %c0_i32_0 = arith.constant 0 : i32
    %c0_i32_1 = arith.constant 0 : i32
    return %c0_i32, %c0_i32_0 : i32, i32
  }
  func.func @transform_3(%arg0: i32) -> (i32, i32) {
    %c0_i32 = arith.constant 0 : i32
    %c0_i32_0 = arith.constant 0 : i32
    %c0_i32_1 = arith.constant 0 : i32
    return %c0_i32, %c0_i32_0 : i32, i32
  }
  func.func @transform_4(%arg0: i32) -> (i32, i32) {
    %c0_i32 = arith.constant 0 : i32
    %c0_i32_0 = arith.constant 0 : i32
    %c0_i32_1 = arith.constant 0 : i32
    return %c0_i32, %c0_i32_0 : i32, i32
  }
  func.func @transform_5(%arg0: i32) -> (i32, i32) {
    %c0_i32 = arith.constant 0 : i32
    %c0_i32_0 = arith.constant 0 : i32
    %c0_i32_1 = arith.constant 0 : i32
    return %c0_i32, %c0_i32_0 : i32, i32
  }
  func.func @transform_6(%arg0: i32) -> (i32, i32) {
    %c0_i32 = arith.constant 0 : i32
    %c0_i32_0 = arith.constant 0 : i32
    %c0_i32_1 = arith.constant 0 : i32
    return %c0_i32, %c0_i32_0 : i32, i32
  }
  func.func @transform_7(%arg0: i32) -> (i32, i32) {
    %c0_i32 = arith.constant 0 : i32
    %c0_i32_0 = arith.constant 0 : i32
    %c0_i32_1 = arith.constant 0 : i32
    return %c0_i32, %c0_i32_0 : i32, i32
  }
  func.func @transform_8(%arg0: i32) -> (i32, i32) {
    %c0_i32 = arith.constant 0 : i32
    %c0_i32_0 = arith.constant 0 : i32
    return %arg0, %c0_i32 : i32, i32
  }
}

module attributes {stable_mosaic.version = 11 : i64} {
  func.func @probing_pair_kernel(%arg0: i32, %arg1: memref<8x1x2xi32, #tpu.memory_space<vmem>>, %arg2: memref<64x32xbf16, #tpu.memory_space<vmem>>, %arg3: memref<32x128xbf16, #tpu.memory_space<vmem>>, %arg4: memref<1x128xf32, #tpu.memory_space<vmem>>, %arg5: memref<128x128xbf16, #tpu.memory_space<vmem>>, %arg6: memref<1x128xf32, #tpu.memory_space<vmem>>, %arg7: memref<128x128xbf16, #tpu.memory_space<vmem>>, %arg8: memref<1x128xf32, #tpu.memory_space<vmem>>, %arg9: memref<8x128xf32, #tpu.memory_space<vmem>>) attributes {dimension_semantics = [#tpu.dimension_semantics<parallel>], iteration_bounds = array<i64: 2>, scalar_prefetch = 0 : i64, scratch_operands = 0 : i64, tpu.core_type = #tpu.core_type<tc>, window_params = [{transform_indices = @transform_0, window_bounds = array<i64: 8, 1, 2>}, {transform_indices = @transform_1, window_bounds = array<i64: 64, 32>}, {pipeline_mode = #tpu.pipeline_mode<synchronous>, transform_indices = @transform_2, window_bounds = array<i64: 32, 128>}, {pipeline_mode = #tpu.pipeline_mode<synchronous>, transform_indices = @transform_3, window_bounds = array<i64: 1, 128>}, {pipeline_mode = #tpu.pipeline_mode<synchronous>, transform_indices = @transform_4, window_bounds = array<i64: 128, 128>}, {pipeline_mode = #tpu.pipeline_mode<synchronous>, transform_indices = @transform_5, window_bounds = array<i64: 1, 128>}, {pipeline_mode = #tpu.pipeline_mode<synchronous>, transform_indices = @transform_6, window_bounds = array<i64: 128, 128>}, {pipeline_mode = #tpu.pipeline_mode<synchronous>, transform_indices = @transform_7, window_bounds = array<i64: 1, 128>}, {transform_indices = @transform_8, window_bounds = array<i64: 8, 128>}]} {
    %c0 = arith.constant 0 : index
    %c0_0 = arith.constant 0 : index
    %0 = vector.load %arg2[%c0, %c0_0] : memref<64x32xbf16, #tpu.memory_space<vmem>>, vector<64x32xbf16>
    %c0_1 = arith.constant 0 : index
    %c0_2 = arith.constant 0 : index
    %1 = vector.load %arg3[%c0_1, %c0_2] : memref<32x128xbf16, #tpu.memory_space<vmem>>, vector<32x128xbf16>
    %cst = arith.constant dense<0.000000e+00> : vector<64x128xf32>
    %2 = tpu.matmul %0, %1, %cst {dimension_numbers = #tpu.dot_dimension_numbers<[1], [0], [0], [1], [0, 0, 1, 1], [], []>} : vector<64x32xbf16>, vector<32x128xbf16>, vector<64x128xf32> -> vector<64x128xf32>
    %c0_3 = arith.constant 0 : index
    %c0_4 = arith.constant 0 : index
    %3 = vector.load %arg4[%c0_3, %c0_4] : memref<1x128xf32, #tpu.memory_space<vmem>>, vector<1x128xf32>
    %4 = vector.broadcast %3 : vector<1x128xf32> to vector<64x128xf32>
    %5 = arith.addf %2, %4 : vector<64x128xf32>
    %cst_5 = arith.constant 0.000000e+00 : f32
    %6 = vector.broadcast %cst_5 : f32 to vector<64x128xf32>
    %7 = arith.maximumf %5, %6 : vector<64x128xf32>
    %8 = arith.truncf %7 : vector<64x128xf32> to vector<64x128xbf16>
    %c0_6 = arith.constant 0 : index
    %c0_7 = arith.constant 0 : index
    %9 = vector.load %arg5[%c0_6, %c0_7] : memref<128x128xbf16, #tpu.memory_space<vmem>>, vector<128x128xbf16>
    %cst_8 = arith.constant dense<0.000000e+00> : vector<64x128xf32>
    %10 = tpu.matmul %8, %9, %cst_8 {dimension_numbers = #tpu.dot_dimension_numbers<[1], [0], [0], [1], [0, 0, 1, 1], [], []>} : vector<64x128xbf16>, vector<128x128xbf16>, vector<64x128xf32> -> vector<64x128xf32>
    %c0_9 = arith.constant 0 : index
    %c0_10 = arith.constant 0 : index
    %11 = vector.load %arg6[%c0_9, %c0_10] : memref<1x128xf32, #tpu.memory_space<vmem>>, vector<1x128xf32>
    %12 = vector.broadcast %11 : vector<1x128xf32> to vector<64x128xf32>
    %13 = arith.addf %10, %12 : vector<64x128xf32>
    %c0_11 = arith.constant 0 : index
    %c0_12 = arith.constant 0 : index
    %c0_13 = arith.constant 0 : index
    %14 = vector.load %arg1[%c0_11, %c0_12, %c0_13] : memref<8x1x2xi32, #tpu.memory_space<vmem>>, vector<8x1x2xi32>
    %15 = vector.extract_strided_slice %14 {offsets = [0, 0, 0], sizes = [8, 1, 1], strides = [1, 1, 1]} : vector<8x1x2xi32> to vector<8x1x1xi32>
    %16 = vector.extract_strided_slice %14 {offsets = [0, 0, 1], sizes = [8, 1, 1], strides = [1, 1, 1]} : vector<8x1x2xi32> to vector<8x1x1xi32>
    %17 = tpu.iota {dimensions = array<i32: 0>} : vector<8x1xi32>
    %18 = arith.subi %16, %15 : vector<8x1x1xi32>
    %19 = arith.sitofp %18 : vector<8x1x1xi32> to vector<8x1x1xf32>
    %cst_14 = arith.constant 1.000000e+00 : f32
    %20 = vector.broadcast %cst_14 : f32 to vector<8x1x1xf32>
    %21 = arith.maximumf %19, %20 : vector<8x1x1xf32>
    %22 = tpu.reciprocal %21 {approx = true} : vector<8x1x1xf32> -> vector<8x1x1xf32>
    %23 = vector.shape_cast %17 : vector<8x1xi32> to vector<1x8x1xi32>
    %24 = vector.broadcast %23 : vector<1x8x1xi32> to vector<8x8x1xi32>
    %25 = vector.broadcast %15 : vector<8x1x1xi32> to vector<8x8x1xi32>
    %26 = arith.cmpi sge, %24, %25 : vector<8x8x1xi32>
    %27 = vector.shape_cast %17 : vector<8x1xi32> to vector<1x8x1xi32>
    %28 = vector.broadcast %27 : vector<1x8x1xi32> to vector<8x8x1xi32>
    %29 = vector.broadcast %16 : vector<8x1x1xi32> to vector<8x8x1xi32>
    %30 = arith.cmpi slt, %28, %29 : vector<8x8x1xi32>
    %31 = arith.andi %26, %30 : vector<8x8x1xi1>
    %cst_15 = arith.constant 0.000000e+00 : f32
    %32 = vector.shape_cast %22 : vector<8x1x1xf32> to vector<8x1x1xf32>
    %33 = vector.broadcast %32 : vector<8x1x1xf32> to vector<8x8x1xf32>
    %34 = vector.broadcast %cst_15 : f32 to vector<8x8x1xf32>
    %35 = arith.select %31, %33, %34 : vector<8x8x1xi1>, vector<8x8x1xf32>
    %36 = vector.shape_cast %13 : vector<64x128xf32> to vector<8x8x128xf32>
    %37 = vector.broadcast %35 : vector<8x8x1xf32> to vector<8x8x128xf32>
    %38 = arith.mulf %36, %37 : vector<8x8x128xf32>
    %cst_16 = arith.constant dense<0.000000e+00> : vector<8x128xf32>
    %39 = vector.multi_reduction <add>, %38, %cst_16 [1] : vector<8x8x128xf32> to vector<8x128xf32>
    %40 = arith.truncf %39 : vector<8x128xf32> to vector<8x128xbf16>
    %c0_17 = arith.constant 0 : index
    %c0_18 = arith.constant 0 : index
    %41 = vector.load %arg7[%c0_17, %c0_18] : memref<128x128xbf16, #tpu.memory_space<vmem>>, vector<128x128xbf16>
    %cst_19 = arith.constant dense<0.000000e+00> : vector<8x128xf32>
    %42 = tpu.matmul %40, %41, %cst_19 {dimension_numbers = #tpu.dot_dimension_numbers<[1], [0], [0], [1], [0, 0, 1, 1], [], []>} : vector<8x128xbf16>, vector<128x128xbf16>, vector<8x128xf32> -> vector<8x128xf32>
    %c0_20 = arith.constant 0 : index
    %c0_21 = arith.constant 0 : index
    %43 = vector.load %arg8[%c0_20, %c0_21] : memref<1x128xf32, #tpu.memory_space<vmem>>, vector<1x128xf32>
    %44 = vector.broadcast %43 : vector<1x128xf32> to vector<8x128xf32>
    %45 = arith.addf %42, %44 : vector<8x128xf32>
    %c0_22 = arith.constant 0 : index
    %c0_23 = arith.constant 0 : index
    %46 = vector.load %arg9[%c0_22, %c0_23] : memref<8x128xf32, #tpu.memory_space<vmem>>, vector<8x128xf32>
    tpu.vector_store %arg9[%c0_22, %c0_23], %45 {strides = array<i32>} : memref<8x128xf32, #tpu.memory_space<vmem>>, vector<8x128xf32>,
    return
  }
  func.func @transform_0(%arg0: i32) -> (i32, i32, i32) {
    %c0_i32 = arith.constant 0 : i32
    %c0_i32_0 = arith.constant 0 : i32
    %c0_i32_1 = arith.constant 0 : i32
    return %arg0, %c0_i32, %c0_i32_0 : i32, i32, i32
  }
  func.func @transform_1(%arg0: i32) -> (i32, i32) {
    %c0_i32 = arith.constant 0 : i32
    %c0_i32_0 = arith.constant 0 : i32
    return %arg0, %c0_i32 : i32, i32
  }
  func.func @transform_2(%arg0: i32) -> (i32, i32) {
    %c0_i32 = arith.constant 0 : i32
    %c0_i32_0 = arith.constant 0 : i32
    %c0_i32_1 = arith.constant 0 : i32
    return %c0_i32, %c0_i32_0 : i32, i32
  }
  func.func @transform_3(%arg0: i32) -> (i32, i32) {
    %c0_i32 = arith.constant 0 : i32
    %c0_i32_0 = arith.constant 0 : i32
    %c0_i32_1 = arith.constant 0 : i32
    return %c0_i32, %c0_i32_0 : i32, i32
  }
  func.func @transform_4(%arg0: i32) -> (i32, i32) {
    %c0_i32 = arith.constant 0 : i32
    %c0_i32_0 = arith.constant 0 : i32
    %c0_i32_1 = arith.constant 0 : i32
    return %c0_i32, %c0_i32_0 : i32, i32
  }
  func.func @transform_5(%arg0: i32) -> (i32, i32) {
    %c0_i32 = arith.constant 0 : i32
    %c0_i32_0 = arith.constant 0 : i32
    %c0_i32_1 = arith.constant 0 : i32
    return %c0_i32, %c0_i32_0 : i32, i32
  }
  func.func @transform_6(%arg0: i32) -> (i32, i32) {
    %c0_i32 = arith.constant 0 : i32
    %c0_i32_0 = arith.constant 0 : i32
    %c0_i32_1 = arith.constant 0 : i32
    return %c0_i32, %c0_i32_0 : i32, i32
  }
  func.func @transform_7(%arg0: i32) -> (i32, i32) {
    %c0_i32 = arith.constant 0 : i32
    %c0_i32_0 = arith.constant 0 : i32
    %c0_i32_1 = arith.constant 0 : i32
    return %c0_i32, %c0_i32_0 : i32, i32
  }
  func.func @transform_8(%arg0: i32) -> (i32, i32) {
    %c0_i32 = arith.constant 0 : i32
    %c0_i32_0 = arith.constant 0 : i32
    return %arg0, %c0_i32 : i32, i32
  }
}

</mosaic_0001>

<bundles_post_ra>
// kernel: tpu_custom_call.1
= control target key start
LH: loop header
LB: loop body
LE: loop exit
PB: predicated region body
PF: predicated region fallthrough
CT: control target
= control target key end

     0   :  { %13 = vsyncpa [#allocation3], 0  ;;  %s1659_s0 = inlined_call_operand.vmem [shape: s32[16,1,2], index: 0, kind: input, shape index: {}]   ;;  %s1660_s1 = inlined_call_operand.vmem [shape: bf16[128,32], index: 1, kind: input, shape index: {}]   ;;  %s1661_s2 = inlined_call_operand.vmem [shape: bf16[32,128], index: 2, kind: input, shape index: {}]   ;;  %s1662_s3 = inlined_call_operand.vmem [shape: f32[1,128], index: 3, kind: input, shape index: {}]   ;;  %s1663_s4 = inlined_call_operand.vmem [shape: bf16[128,128], index: 4, kind: input, shape index: {}]   ;;  %s1664_s5 = inlined_call_operand.vmem [shape: f32[1,128], index: 5, kind: input, shape index: {}]   ;;  %s1665_s6 = inlined_call_operand.hbm [shape: bf16[128,128], index: 6, kind: input, shape index: {}]   ;;  %s1666_s7 = inlined_call_operand.vmem [shape: f32[1,128], index: 7, kind: input, shape index: {}]   ;;  %s1667_s8 = inlined_call_operand.hbm [shape: f32[16,128], index: 8, kind: output, shape index: {}]  }
   0x1   :  { %14 = vsyncpa [#allocation4], 0 }
   0x2   :  { %16 = vsyncpa [#allocation4 + $0x1], 0  ;;  %s1396_s27 = smov 0   ;;  %s1398_s28 = smov 0  }
   0x3   :  { %s1400_s29 = smov 0   ;;  %s1402_s30 = smov 0  }
   0x4 LB: > { %s1417_s9 = sadd.s32 4294967295, %s1343_s30   ;;  %s1026_s10 = sadd.s32 4294967294, %s1343_s30   ;;  %s1343_s30 = sphi %s1402_s30, %s1673_s30   ;;  %s1339_s29 = sphi %s1400_s29, %s1672_s29   ;;  %s1335_s28 = sphi %s1398_s28, %s1671_s28   ;;  %s1331_s27 = sphi %s1396_s27, %s1670_s27  }
   0x5   : > { %s1421_s11 = sadd.s32 1, %s1343_s30   ;;  %s207_s12 = sadd.s32 1, %s1339_s29 }
   0x6   : > { %s204_s13 = ssub.s32 %s1343_s30, %s1421_s11  ;;  %p217_p0 = scmp.ne.s32.totalorder %s1339_s29, %s1335_s28 }
   0x7   : > { %p205_p1 = scmp.eq.s32.totalorder %s204_s13, 0  ;;  %p218_p2 = scmp.eq.s32.totalorder %s1417_s9, 1 }
   0x8   : > { %p223_p3 = scmp.ne.s32.totalorder %s1335_s28, %s1331_s27  ;;  %p224_p4 = scmp.eq.s32.totalorder %s1026_s10, 1 }
   0x9   : > { %s1432_s14 = scalar_select %p205_p1, %s1339_s29, %s207_s12  }
   0xa   : > { %p1434_p5 = por %p218_p2, %p217_p0  ;;  %p1438_p6 = por %p224_p4, %p223_p3 }
   0xb   : > { %p1027_p7 = scmp.ge.s32.totalorder %s1343_s30, 1  ;;  %p231_p8 = scmp.lt.s32.totalorder %s1343_s30, 3 }
   0xc   : > { %p1176_p9 = scmp.eq.s32.totalorder %s1417_s9, 0  ;;  %s254_s19 = sshll.u32 %s1665_s6, 4  ;;  %s255_s19 = int_to_ptr.hbm [resolvable:$true] %s254_s19 }
   0xd   : > { %p232_p10 = pnand %p1027_p7, %p231_p8  ;;  %s1345_s20 = smov [#allocation2]  }
   0xe   : > { %s256_s21 = sshll.u32 %s1345_s20, 4  ;;  %s1346_s22 = smov 64   ;;  %s257_s21 = int_to_ptr.vmem [resolvable:$true] %s256_s21 }
   0xf   : > { %p1168_p11 = pneg %p232_p10  ;;  %s1347_s23 = smov 4  }
  0x10   : > { %292 = sbr.rel (%p232_p10) target bundleno = 576 (0x240), region = 52 }
  0x11   : > { %p1169_p12 = pnand %p1176_p9, %p1168_p11 }
  0x13   : > { %1171 = dma.hbm_to_vmem [thread:$0]  (!%p1169_p12), %s255_s19, 1024, %s257_s21, [#allocation3], %s1346_s22, %s1346_s22, %s1347_s23  }
  0x15   : > { %1322 = dma.done.wait (%p1176_p9), [#allocation3], 1024  }
  0x16   : > { %1324 = vsyncadd (%p1176_p9), [#allocation3], 4294966272  ;;  %s1455_s24 = sshll.u32 %s1417_s9, 3  ;;  %s1348_s9 = smov 1   ;;  %v1137_v2 = vld [vmem:[%s1661_s2 + $0x8] sm:$0xff]  ;;  %v1136_v6 = vld [vmem:[%s1661_s2] sm:$0xff]  ;;  %v550_v13 = vlaneseq }
  0x17   : > { %p332_p13 = scmp.lt.s32.totalorder %s1455_s24, 15  ;;  %410 = vmatpush.bf16.msra.mxu0 %v1137_v2  ;;  %vm391_vm0 = vcmask 261120   ;;  %v1349_v14 = vmov 0   ;;  %v1145_v36 = vld [vmem:[%s1663_s4 + $0x38] sm:$0xff]  ;;  %v1144_v39 = vld [vmem:[%s1663_s4 + $0x30] sm:$0xff]  ;;  %v1143_v49 = vld [vmem:[%s1663_s4 + $0x28] sm:$0xff] }
  0x18   : > { %1217 = vset.pattern.permute.xlu0 %v1349_v14  ;;  %1219 = vset.pattern.permute.xlu2 %v1349_v14  ;;  %v1510_v15 = vshrl.u32 %v550_v13, 7  ;;  %v1142_v53 = vld [vmem:[%s1663_s4 + $0x20] sm:$0xff]  ;;  %v1141_v62 = vld [vmem:[%s1663_s4 + $0x18] sm:$0xff]  ;;  %s328_s19 = sand.u32 1, %s1335_s28   ;;  %s1297_s22 = scalar_lea.hbm %s1667_s8, 16 }
  0x19   : > { %s333_s25 = scalar_select %p332_p13, %s1455_s24, 15  ;;  %1218 = vset.pattern.permute.xlu1 %v1349_v14  ;;  %513 = vmatpush.bf16.msra.mxu1 %v1145_v36 }
  0x1a   : > { %1154 = vmatpush.bf16.msra.mxu3 %v1145_v36  ;;  %s1032_s20 = sshll.u32 %s328_s19, 3  ;;  %s931_s17 = scalar_lea.sflag [#allocation4], %s328_s19 }
  0x1b   : > { %s1462_s12 = scalar_lea.vmem %s1659_s0, %s333_s25  ;;  %s1035_s18 = sshll.u32 %s333_s25, 2  ;;  %411 = vmatpush.bf16.msra.mxu0 %v1136_v6 }
  0x1c   : > { %v1465_v0 = vld [vmem:[%s1462_s12] sm:$0x1]  ;;  %v1468_v1 = vld [vmem:[%s1462_s12 + $0x2] sm:$0x1]  ;;  %v1476_v3 = vld [vmem:[%s1462_s12 + $0x4] sm:$0x1]  ;;  %s340_s23 = scalar_lea.vmem %s1660_s1, %s1035_s18 }
  0x1d   : > { %552 = vrot.lane.b32.xlu0 %v1465_v0, %s1348_s9  ;;  %556 = vrot.lane.b32.xlu1 %v1468_v1, %s1348_s9  ;;  %v1480_v4 = vld [vmem:[%s1462_s12 + $0x1] sm:$0x1]  ;;  %v1483_v5 = vld [vmem:[%s1462_s12 + $0x3] sm:$0x1]  ;;  %s1350_s25 = smov 127  }
  0x1e   : > { %560 = vrot.lane.b32.xlu2 %v1476_v3, %s1348_s9  ;;  %v1132_v7 = vld [vmem:[%s340_s23] sm:$0xff]  ;;  %v1133_v11 = vld [vmem:[%s340_s23 + $0x8] sm:$0xff]  ;;  %v1134_v17 = vld [vmem:[%s340_s23 + $0x10] sm:$0xff]  ;;  %514 = vmatpush.bf16.msra.mxu1 %v1144_v39 }
  0x1f   : > { %v1494_v8 = vld [vmem:[%s1462_s12 + $0x5] sm:$0x1]  ;;  %1060 = vmatmul.msk.bf16.vlgmr.msra.gmra.mxu0 %vm391_vm0, %v1132_v7  ;;  %v1499_v9 = vld [vmem:[%s1462_s12 + $0x6] sm:$0x1]  ;;  %v1502_v10 = vld [vmem:[%s1462_s12 + $0x7] sm:$0x1]  ;;  %1155 = vmatpush.bf16.msra.mxu3 %v1144_v39 }
  0x20   : > { %v1507_v12 = vld [vmem:[%s1462_s12 + $0x1] ss:$0 sm:$0xff]  ;;  %v1135_v18 = vld [vmem:[%s340_s23 + $0x18] sm:$0xff]  ;;  %v1518_v19 = vld [vmem:[%s1462_s12] ss:$0 sm:$0xff]  ;;  %s941_s23 = scalar_lea.hbm %s1667_s8, %s1455_s24 }
  0x21   : > { %vm617_vm1 = vcmp.lt.s32.totalorder %v1510_v15, %v1507_v12  ;;  %vm616_vm2 = vcmp.lt.s32.totalorder %v1510_v15, %v1518_v19  ;;  %v1523_v21 = vld [vmem:[%s1462_s12 + $0x2] ss:$0 sm:$0xff]  ;;  %v1526_v22 = vld [vmem:[%s1462_s12 + $0x6] ss:$0 sm:$0xff]  ;;  %v1530_v23 = vld [vmem:[%s1462_s12 + $0x3] ss:$0 sm:$0xff]  ;;  %vm608_vm10 = vcmp.ge.s32.totalorder %v1510_v15, %v1518_v19  ;;  %vm609_vm13 = vcmp.ge.s32.totalorder %v1510_v15, %v1507_v12 }
  0x22   : > { %v625_v16 = vsel %vm617_vm1, 1, %v1349_v14  ;;  %v624_v20 = vsel %vm616_vm2, 1, %v1349_v14  ;;  %vm618_vm3 = vcmp.lt.s32.totalorder %v1510_v15, %v1523_v21  ;;  %vm622_vm4 = vcmp.lt.s32.totalorder %v1510_v15, %v1526_v22  ;;  %v1541_v27 = vld [vmem:[%s1462_s12 + $0x5] ss:$0 sm:$0xff]  ;;  %v1545_v28 = vld [vmem:[%s1462_s12 + $0x4] ss:$0 sm:$0xff]  ;;  %515 = vmatpush.bf16.msra.mxu1 %v1143_v49 }
  0x23   : > { %v626_v24 = vsel %vm618_vm3, 1, %v1349_v14  ;;  %v630_v25 = vsel %vm622_vm4, 1, %v1349_v14  ;;  %vm619_vm5 = vcmp.lt.s32.totalorder %v1510_v15, %v1530_v23  ;;  %vm621_vm6 = vcmp.lt.s32.totalorder %v1510_v15, %v1541_v27  ;;  %v1554_v31 = vld [vmem:[%s1462_s12 + $0x7] ss:$0 sm:$0xff]  ;;  %1156 = vmatpush.bf16.msra.mxu3 %v1143_v49  ;;  %s330_s12 = scalar_lea.vmem [#allocation5], %s1032_s20  ;;  %s945_s13 = sshll.u32 %s941_s23, 4  ;;  %s946_s13 = int_to_ptr.hbm [resolvable:$true] %s945_s13 }
  0x24   : > { %v627_v26 = vsel %vm619_vm5, 1, %v1349_v14  ;;  %v629_v29 = vsel %vm621_vm6, 1, %v1349_v14  ;;  %vm620_vm7 = vcmp.lt.s32.totalorder %v1510_v15, %v1545_v28  ;;  %vm623_vm8 = vcmp.lt.s32.totalorder %v1510_v15, %v1554_v31 }
  0x25   : > { %554 = vrot.lane.b32.xlu0 %v1480_v4, %s1348_s9  ;;  %558 = vrot.lane.b32.xlu1 %v1483_v5, %s1348_s9  ;;  %v628_v30 = vsel %vm620_vm7, 1, %v1349_v14  ;;  %v631_v32 = vsel %vm623_vm8, 1, %v1349_v14  ;;  %vm610_vm15 = vcmp.ge.s32.totalorder %v1510_v15, %v1523_v21  ;;  %vm611_vm3 = vcmp.ge.s32.totalorder %v1510_v15, %v1530_v23 }
  0x26   : > { %562 = vrot.lane.b32.xlu2 %v1494_v8, %s1348_s9  ;;  %516 = vmatpush.bf16.msra.mxu1 %v1142_v53  ;;  %vm612_vm5 = vcmp.ge.s32.totalorder %v1510_v15, %v1545_v28  ;;  %vm613_vm7 = vcmp.ge.s32.totalorder %v1510_v15, %v1541_v27 }
  0x27   : > { %1157 = vmatpush.bf16.msra.mxu3 %v1142_v53 }
  0x2a   : > { %517 = vmatpush.bf16.msra.mxu1 %v1141_v62 }
  0x2b   : > { %1158 = vmatpush.bf16.msra.mxu3 %v1141_v62 }
  0x2d   : > { %564 = vrot.lane.b32.xlu0 %v1499_v9, %s1348_s9  ;;  %566 = vrot.lane.b32.xlu1 %v1502_v10, %s1348_s9  ;;  %s943_s9 = sshll.u32 %s330_s12, 4  ;;  %s944_s9 = int_to_ptr.vmem [resolvable:$true] %s943_s9 }
  0x2e   : > { %632 = vrot.lane.b32.xlu2 %v624_v20, %s1350_s25 }
  0x2f   : > { %1061 = vmatmul.msk.bf16.gmra.mxu0 %vm391_vm0, %v1133_v11 }
  0x35   : > { %634 = vrot.lane.b32.xlu0 %v625_v16, %s1350_s25  ;;  %636 = vrot.lane.b32.xlu1 %v626_v24, %s1350_s25  ;;  %v1228_v24 = vld [vmem:[%s1662_s3] ss:$0 sm:$0xff] }
  0x36   : > { %638 = vrot.lane.b32.xlu2 %v627_v26, %s1350_s25  ;;  %v1138_v26 = vld [vmem:[%s1663_s4] sm:$0xff] }
  0x3d   : > { %644 = vrot.lane.b32.xlu0 %v630_v25, %s1350_s25  ;;  %642 = vrot.lane.b32.xlu1 %v629_v29, %s1350_s25 }
  0x3e   : > { %640 = vrot.lane.b32.xlu2 %v628_v30, %s1350_s25 }
  0x3f   : > { %1062 = vmatmul.msk.bf16.gmra.mxu0 %vm391_vm0, %v1134_v17 }
  0x46   : > { %646 = vrot.lane.b32.xlu2 %v631_v32, %s1350_s25 }
  0x4f   : > { %1063 = vmatmul.msk.bf16.gmra.mxu0 %vm391_vm0, %v1135_v18 }
  0x78   : > { %v561_v33 = vpop.permute.xlu2 %560 }
  0x79   : > { %v572_v44 = vsub.s32 %v1476_v3, %v561_v33 }
  0x7b   : > { %v580_v52 = vcvt.s32.f32 %v572_v44 }
  0x7d   : > { %v588_v61 = vmax.f32 %v580_v52, 1.0 }
  0x80   : > { %v563_v42 = vpop.permute.xlu2 %562 }
  0x81   : > { %v573_v46 = vsub.s32 %v1494_v8, %v563_v42 }
  0x83   : > { %v581_v55 = vcvt.s32.f32 %v573_v46 }
  0x85   : > { %v589_v63 = vmax.f32 %v581_v55, 1.0 }
  0x8f   : > { %v553_v34 = vpop.permute.xlu0 %552  ;;  %v557_v35 = vpop.permute.xlu1 %556 }
  0x90   : > { %v568_v37 = vsub.s32 %v1465_v0, %v553_v34  ;;  %v570_v38 = vsub.s32 %v1468_v1, %v557_v35 }
  0x92   : > { %v576_v40 = vcvt.s32.f32 %v568_v37  ;;  %v578_v41 = vcvt.s32.f32 %v570_v38 }
  0x94   : > { %v584_v43 = vmax.f32 %v576_v40, 1.0  ;;  %v586_v45 = vmax.f32 %v578_v41, 1.0 }
  0x96   : > { %1231 = vrcp.f32 %v584_v43 }
  0x97   : > { %v555_v47 = vpop.permute.xlu0 %554  ;;  %v559_v48 = vpop.permute.xlu1 %558  ;;  %1233 = vrcp.f32 %v586_v45 }
  0x98   : > { %v569_v50 = vsub.s32 %v1480_v4, %v555_v47  ;;  %v571_v51 = vsub.s32 %v1483_v5, %v559_v48  ;;  %v1140_v5 = vld [vmem:[%s1663_s4 + $0x10] sm:$0xff] }
  0x99   : > { %518 = vmatpush.bf16.msra.mxu1 %v1140_v5  ;;  %1159 = vmatpush.bf16.msra.mxu3 %v1140_v5 }
  0x9a   : > { %v577_v54 = vcvt.s32.f32 %v569_v50  ;;  %v579_v56 = vcvt.s32.f32 %v571_v51 }
  0x9c   : > { %v1232_v57 = vpop.eup %1231  ;;  %v585_v58 = vmax.f32 %v577_v54, 1.0  ;;  %v587_v59 = vmax.f32 %v579_v56, 1.0  ;;  %v413_v18 = vpop.f32.mrf.mxu0 }
  0x9d   : > { %v672_v60 = vperm.slane %v1232_v57, 0  ;;  %v1234_v2 = vpop.eup %1233  ;;  %v414_v32 = vadd.f32 %v1228_v24, %v413_v18 }
  0x9e   : > { %1235 = vrcp.f32 %v585_v58  ;;  %v674_v8 = vperm.slane %v1234_v2, 0 }
  0x9f   : > { %680 = vrot.lane.b32.xlu0 %v672_v60, %s1350_s25  ;;  %1237 = vrcp.f32 %v587_v59  ;;  %v565_v0 = vpop.permute.xlu0 %564  ;;  %v567_v1 = vpop.permute.xlu1 %566  ;;  %v433_v36 = vmax.f32 %v414_v32, 0.0  ;;  %v1151_v32 = vld [vmem:[#allocation2 + $0x28] sm:$0xff] }
  0xa0   : > { %v574_v3 = vsub.s32 %v1499_v9, %v565_v0  ;;  %v575_v4 = vsub.s32 %v1502_v10, %v567_v1  ;;  %1239 = vrcp.f32 %v588_v61  ;;  %v1139_v9 = vld [vmem:[%s1663_s4 + $0x8] sm:$0xff] }
  0xa1   : > { %1241 = vrcp.f32 %v589_v63  ;;  %519 = vmatpush.bf16.msra.mxu1 %v1139_v9  ;;  %1160 = vmatpush.bf16.msra.mxu3 %v1139_v9  ;;  %v633_v63 = vpop.permute.xlu2 %632 }
  0xa2   : > { %v582_v6 = vcvt.s32.f32 %v574_v3  ;;  %v583_v7 = vcvt.s32.f32 %v575_v4  ;;  %vm648_vm9 = vcmp.ne.s32.totalorder %v633_v63, 0 }
  0xa3   : > { %vm656_vm11 = vmand %vm608_vm10, %vm648_vm9 }
  0xa4   : > { %v1236_v11 = vpop.eup %1235  ;;  %v591_v13 = vmax.f32 %v583_v7, 1.0  ;;  %v590_v17 = vmax.f32 %v582_v6, 1.0  ;;  %v415_v35 = vpop.f32.mrf.mxu0 }
  0xa5   : > { %v1238_v14 = vpop.eup %1237  ;;  %v673_v16 = vperm.slane %v1236_v11, 0  ;;  %520 = vmatpush.bf16.msra.mxu1 %v1138_v26  ;;  %1161 = vmatpush.bf16.msra.mxu3 %v1138_v26  ;;  %v416_v37 = vadd.f32 %v1228_v24, %v415_v35  ;;  %v1153_v26 = vld [vmem:[#allocation2 + $0x38] sm:$0xff] }
  0xa6   : > { %v675_v10 = vperm.slane %v1238_v14, 0  ;;  %v1240_v20 = vpop.eup %1239  ;;  %1243 = vrcp.f32 %v591_v13  ;;  %916 = vmatpush.bf16.msra.mxu2 %v1153_v26 }
  0xa7   : > { %684 = vrot.lane.b32.xlu0 %v674_v8, %s1350_s25  ;;  %682 = vrot.lane.b32.xlu1 %v673_v16, %s1350_s25  ;;  %v1242_v25 = vpop.eup %1241  ;;  %1245 = vrcp.f32 %v590_v17  ;;  %v676_v29 = vperm.slane %v1240_v20, 0  ;;  %v434_v39 = vmax.f32 %v416_v37, 0.0  ;;  %v635_v0 = vpop.permute.xlu0 %634 }
  0xa8   : > { %686 = vrot.lane.b32.xlu2 %v675_v10, %s1350_s25  ;;  %v677_v30 = vperm.slane %v1242_v25, 0  ;;  %v637_v2 = vpop.permute.xlu1 %636  ;;  %vm649_vm12 = vcmp.ne.s32.totalorder %v635_v0, 0 }
  0xa9   : > { %v441_v41 = vpack.c.bf16 %v434_v39, %v433_v36  ;;  %v639_v1 = vpop.permute.xlu2 %638  ;;  %vm650_vm14 = vcmp.ne.s32.totalorder %v637_v2, 0  ;;  %vm657_vm0 = vmand %vm609_vm13, %vm649_vm12  ;;  %vm615_vm12 = vcmp.ge.s32.totalorder %v1510_v15, %v1554_v31 }
  0xaa   : > { %vm658_vm1 = vmand %vm610_vm15, %vm650_vm14  ;;  %vm651_vm2 = vcmp.ne.s32.totalorder %v639_v1, 0  ;;  %vm614_vm14 = vcmp.ge.s32.totalorder %v1510_v15, %v1526_v22  ;;  %v1229_v15 = vld [vmem:[%s1664_s5] ss:$0 sm:$0xff] }
  0xab   : > { %521 = vmatmul.bf16.vlgmr.msra.gmra.mxu1 %v441_v41  ;;  %vm659_vm8 = vmand %vm611_vm3, %vm651_vm2  ;;  %v1150_v22 = vld [vmem:[#allocation2 + $0x20] sm:$0xff]  ;;  %vm854_vm2 = vcmask 1042434   ;;  %vm856_vm3 = vcmask 1043459  }
  0xac   : > { %v1244_v33 = vpop.eup %1243  ;;  %v418_v42 = vpop.f32.mrf.mxu0 }
  0xad   : > { %v679_v34 = vperm.slane %v1244_v33, 0  ;;  %v1246_v38 = vpop.eup %1245  ;;  %v419_v43 = vadd.f32 %v1228_v24, %v418_v42 }
  0xae   : > { %v678_v40 = vperm.slane %v1246_v38, 0  ;;  %v1149_v38 = vld [vmem:[#allocation2 + $0x18] sm:$0xff] }
  0xaf   : > { %690 = vrot.lane.b32.xlu0 %v677_v30, %s1350_s25  ;;  %688 = vrot.lane.b32.xlu1 %v676_v29, %s1350_s25  ;;  %v435_v45 = vmax.f32 %v419_v43, 0.0  ;;  %v645_v3 = vpop.permute.xlu0 %644  ;;  %v1152_v30 = vld [vmem:[#allocation2 + $0x30] sm:$0xff] }
  0xb0   : > { %694 = vrot.lane.b32.xlu2 %v679_v34, %s1350_s25  ;;  %v643_v5 = vpop.permute.xlu1 %642  ;;  %vm654_vm13 = vcmp.ne.s32.totalorder %v645_v3, 0  ;;  %917 = vmatpush.bf16.msra.mxu2 %v1152_v30 }
  0xb1   : > { %v641_v4 = vpop.permute.xlu2 %640  ;;  %vm653_vm6 = vcmp.ne.s32.totalorder %v643_v5, 0 }
  0xb2   : > { %vm652_vm4 = vcmp.ne.s32.totalorder %v641_v4, 0  ;;  %vm661_vm10 = vmand %vm613_vm7, %vm653_vm6  ;;  %vm862_vm6 = vcmask 1046534   ;;  %vm864_vm7 = vcmask 1047559  }
  0xb3   : > { %vm660_vm9 = vmand %vm612_vm5, %vm652_vm4  ;;  %vm858_vm4 = vcmask 1044484   ;;  %vm860_vm5 = vcmask 1045509  }
  0xb4   : > { %v420_v44 = vpop.f32.mrf.mxu0  ;;  %918 = vmatpush.bf16.msra.mxu2 %v1151_v32 }
  0xb5   : > { %v421_v46 = vadd.f32 %v1228_v24, %v420_v44 }
  0xb7   : > { %692 = vrot.lane.b32.xlu1 %v678_v40, %s1350_s25  ;;  %v436_v47 = vmax.f32 %v421_v46, 0.0  ;;  %s1291_s25 = sshra.s32 %s946_s13, 4  ;;  %s1292_s25 = int_to_ptr.hbm [resolvable:$true] %s1291_s25 }
  0xb8   : > { %919 = vmatpush.bf16.msra.mxu2 %v1150_v22  ;;  %s1293_s18 = scalar_lea.hbm %s1292_s25, 8  ;;  %p1298_p3 = scmp.lt.s32.totalorder %s1292_s25, %s1667_s8 }
  0xb9   : > { %v442_v48 = vpack.c.bf16 %v436_v47, %v435_v45  ;;  %v647_v8 = vpop.permute.xlu2 %646  ;;  %v1148_v45 = vld [vmem:[#allocation2 + $0x10] sm:$0xff]  ;;  %p1294_p0 = scmp.ne.s32.totalorder %s1292_s25, %s1293_s18  ;;  %p1299_p4 = scmp.lt.s32.totalorder %s1297_s22, %s1293_s18 }
  0xbb   : > { %526 = vmatmul.bf16.gmra.mxu1 %v442_v48  ;;  %p1295_p1 = pnand %p1294_p0, %p1434_p5  ;;  %p1300_p7 = por %p1299_p4, %p1298_p3 }
  0xbc   : > { %v423_v49 = vpop.f32.mrf.mxu0  ;;  %920 = vmatpush.bf16.msra.mxu2 %v1149_v38 }
  0xbd   : > { %v424_v50 = vadd.f32 %v1228_v24, %v423_v49  ;;  %p1296_p2 = pneg %p1295_p1 }
  0xbf   : > { %v437_v52 = vmax.f32 %v424_v50, 0.0  ;;  %p1301_p8 = pnand %p1300_p7, %p1296_p2 }
  0xc0   : > { %921 = vmatpush.bf16.msra.mxu2 %v1148_v45 }
  0xc4   : > { %v425_v51 = vpop.f32.mrf.mxu0 }
  0xc5   : > { %v426_v53 = vadd.f32 %v1228_v24, %v425_v51 }
  0xc7   : > { %v438_v54 = vmax.f32 %v426_v53, 0.0 }
  0xc9   : > { %v443_v55 = vpack.c.bf16 %v438_v54, %v437_v52  ;;  %v1147_v52 = vld [vmem:[#allocation2 + $0x8] sm:$0xff] }
  0xca   : > { %922 = vmatpush.bf16.msra.mxu2 %v1147_v52 }
  0xcb   : > { %531 = vmatmul.bf16.vlgmr.msra.gmra.mxu3 %v443_v55 }
  0xcc   : > { %v428_v56 = vpop.f32.mrf.mxu0 }
  0xcd   : > { %v429_v57 = vadd.f32 %v1228_v24, %v428_v56 }
  0xcf   : > { %v439_v59 = vmax.f32 %v429_v57, 0.0  ;;  %v1146_v57 = vld [vmem:[#allocation2] sm:$0xff] }
  0xd0   : > { %923 = vmatpush.bf16.msra.mxu2 %v1146_v57 }
  0xd4   : > { %v430_v58 = vpop.f32.mrf.mxu0 }
  0xd5   : > { %v431_v60 = vadd.f32 %v1228_v24, %v430_v58 }
  0xd7   : > { %v440_v61 = vmax.f32 %v431_v60, 0.0 }
  0xd9   : > { %v444_v62 = vpack.c.bf16 %v440_v61, %v439_v59 }
  0xdb   : > { %536 = vmatmul.bf16.gmra.mxu3 %v444_v62 }
 0x102   : > { %v687_v12 = vpop.permute.xlu2 %686 }
 0x103   : > { %v707_v9 = vsel %vm659_vm8, %v687_v12, 0.0 }
 0x10a   : > { %v695_v23 = vpop.permute.xlu2 %694 }
 0x111   : > { %v681_v6 = vpop.permute.xlu0 %680 }
 0x112   : > { %v704_v7 = vsel %vm656_vm11, %v681_v6, 0.0  ;;  %vm655_vm11 = vcmp.ne.s32.totalorder %v647_v8, 0 }
 0x113   : > { %714 = vperm.xlu0 %1217, %v704_v7   ;;  %vm663_vm15 = vmand %vm615_vm12, %vm655_vm11 }
 0x114   : > { %v711_v28 = vsel %vm663_vm15, %v695_v23, 0.0 }
 0x119   : > { %v683_v11 = vpop.permute.xlu1 %682  ;;  %v685_v13 = vpop.permute.xlu0 %684 }
 0x11a   : > { %v705_v14 = vsel %vm657_vm0, %v683_v11, 0.0  ;;  %v706_v19 = vsel %vm658_vm1, %v685_v13, 0.0  ;;  %vm662_vm0 = vmand %vm614_vm14, %vm654_vm13  ;;  %vm852_vm1 = vcmask 1041409  }
 0x11b   : > { %719 = vperm.xlu1 %1218, %v705_v14   ;;  %724 = vperm.xlu2 %1219, %v706_v19  }
 0x121   : > { %v689_v21 = vpop.permute.xlu1 %688  ;;  %v691_v16 = vpop.permute.xlu0 %690 }
 0x122   : > { %v708_v10 = vsel %vm660_vm9, %v689_v21, 0.0  ;;  %v709_v17 = vsel %vm661_vm10, %v691_v16, 0.0 }
 0x123   : > { %734 = vperm.xlu2 %1219, %v708_v10   ;;  %729 = vperm.xlu1 %1218, %v707_v9  }
 0x124   : > { %739 = vperm.xlu0 %1217, %v709_v17  }
 0x128   : > { %v522_v24 = vpop.f32.mrf.mxu1 }
 0x129   : > { %v693_v27 = vpop.permute.xlu1 %692  ;;  %v523_v37 = vadd.f32 %v1229_v15, %v522_v24 }
 0x12a   : > { %v710_v18 = vsel %vm662_vm0, %v693_v27, 0.0 }
 0x12b   : > { %744 = vperm.xlu1 %1218, %v710_v18   ;;  %749 = vperm.xlu2 %1219, %v711_v28  }
 0x130   : > { %v524_v29 = vpop.f32.mrf.mxu1 }
 0x131   : > { %v525_v50 = vadd.f32 %v1229_v15, %v524_v29 }
 0x138   : > { %v527_v34 = vpop.f32.mrf.mxu1 }
 0x139   : > { %v528_v36 = vadd.f32 %v1229_v15, %v527_v34 }
 0x140   : > { %v529_v61 = vpop.f32.mrf.mxu1 }
 0x141   : > { %v530_v3 = vadd.f32 %v1229_v15, %v529_v61 }
 0x14e   : > { %v532_v20 = vpop.f32.mrf.mxu3 }
 0x14f   : > { %v533_v41 = vadd.f32 %v1229_v15, %v532_v20 }
 0x156   : > { %v534_v25 = vpop.f32.mrf.mxu3 }
 0x157   : > { %v535_v5 = vadd.f32 %v1229_v15, %v534_v25 }
 0x15e   : > { %v1618_v33 = vpop.f32.mrf.mxu3 }
 0x15f   : > { %v538_v25 = vadd.f32 %v1229_v15, %v1618_v33 }
 0x166   : > { %v539_v43 = vpop.f32.mrf.mxu3 }
 0x167   : > { %v540_v48 = vadd.f32 %v1229_v15, %v539_v43 }
 0x175   : > { %v725_v31 = vpop.permute.xlu2 %724 }
 0x176   : > { %v754_v39 = vmul.f32 %v725_v31, %v528_v36 }
 0x178   : > { %v772_v46 = vrot.slane %v754_v39, 4 }
 0x17a   : > { %v773_v53 = vadd.f32 %v772_v46, %v754_v39 }
 0x17c   : > { %v774_v62 = vrot.slane %v773_v53, 2 }
 0x17d   : > { %v735_v35 = vpop.permute.xlu2 %734 }
 0x17e   : > { %v756_v47 = vmul.f32 %v735_v35, %v533_v41  ;;  %v775_v6 = vadd.f32 %v774_v62, %v773_v53 }
 0x180   : > { %v784_v55 = vrot.slane %v756_v47, 4  ;;  %v776_v10 = vrot.slane %v775_v6, 1 }
 0x182   : > { %v785_v63 = vadd.f32 %v784_v55, %v756_v47  ;;  %v777_v29 = vadd.f32 %v776_v10, %v775_v6 }
 0x184   : > { %v786_v8 = vrot.slane %v785_v63, 2  ;;  %v810_v41 = vpack.c.bf16 %v777_v29, %v777_v29 }
 0x185   : > { %v715_v40 = vpop.permute.xlu0 %714  ;;  %v750_v51 = vpop.permute.xlu2 %749 }
 0x186   : > { %v752_v42 = vmul.f32 %v715_v40, %v523_v37  ;;  %v759_v58 = vmul.f32 %v750_v51, %v540_v48  ;;  %v787_v23 = vadd.f32 %v786_v8, %v785_v63  ;;  %v1230_v8 = vld [vmem:[%s1666_s7] ss:$0 sm:$0xff] }
 0x188   : > { %v760_v44 = vrot.slane %v752_v42, 4  ;;  %v802_v1 = vrot.slane %v759_v58, 4  ;;  %v788_v22 = vrot.slane %v787_v23, 1 }
 0x18a   : > { %v761_v49 = vadd.f32 %v760_v44, %v752_v42  ;;  %v803_v19 = vadd.f32 %v802_v1, %v759_v58  ;;  %v789_v44 = vadd.f32 %v788_v22, %v787_v23 }
 0x18c   : > { %v762_v59 = vrot.slane %v761_v49, 2  ;;  %v804_v18 = vrot.slane %v803_v19, 2  ;;  %v812_v52 = vpack.c.bf16 %v789_v44, %v789_v44 }
 0x18d   : > { %v720_v54 = vpop.permute.xlu1 %719 }
 0x18e   : > { %v753_v56 = vmul.f32 %v720_v54, %v525_v50  ;;  %v763_v2 = vadd.f32 %v762_v59, %v761_v49  ;;  %v805_v36 = vadd.f32 %v804_v18, %v803_v19  ;;  %v846_v49 = vunpack.c.l.b16 %v810_v41 }
 0x190   : > { %v766_v60 = vrot.slane %v753_v56, 4  ;;  %v764_v12 = vrot.slane %v763_v2, 1  ;;  %v806_v15 = vrot.slane %v805_v36, 1 }
 0x192   : > { %v767_v0 = vadd.f32 %v766_v60, %v753_v56  ;;  %v765_v20 = vadd.f32 %v764_v12, %v763_v2  ;;  %v807_v55 = vadd.f32 %v806_v15, %v805_v36  ;;  %v848_v60 = vunpack.c.l.b16 %v812_v52 }
 0x194   : > { %v768_v4 = vrot.slane %v767_v0, 2  ;;  %v808_v37 = vpack.c.bf16 %v765_v20, %v765_v20  ;;  %v815_v62 = vpack.c.bf16 %v807_v55, %v807_v55 }
 0x195   : > { %v730_v7 = vpop.permute.xlu1 %729 }
 0x196   : > { %v769_v11 = vadd.f32 %v768_v4, %v767_v0  ;;  %v755_v13 = vmul.f32 %v730_v7, %v530_v3  ;;  %v740_v14 = vpop.permute.xlu0 %739  ;;  %v844_v46 = vunpack.c.l.b16 %v808_v37  ;;  %v851_v3 = vunpack.c.l.b16 %v815_v62 }
 0x197   : > { %v757_v21 = vmul.f32 %v740_v14, %v535_v5 }
 0x198   : > { %v770_v16 = vrot.slane %v769_v11, 1  ;;  %v778_v9 = vrot.slane %v755_v13, 4 }
 0x199   : > { %v790_v17 = vrot.slane %v757_v21, 4 }
 0x19a   : > { %v771_v27 = vadd.f32 %v770_v16, %v769_v11  ;;  %v779_v28 = vadd.f32 %v778_v9, %v755_v13 }
 0x19b   : > { %v791_v24 = vadd.f32 %v790_v17, %v757_v21 }
 0x19c   : > { %v780_v26 = vrot.slane %v779_v28, 2  ;;  %v809_v31 = vpack.c.bf16 %v771_v27, %v771_v27 }
 0x19d   : > { %v792_v30 = vrot.slane %v791_v24, 2  ;;  %v745_v32 = vpop.permute.xlu1 %744 }
 0x19e   : > { %v781_v34 = vadd.f32 %v780_v26, %v779_v28  ;;  %v758_v35 = vmul.f32 %v745_v32, %v538_v25  ;;  %v845_v42 = vunpack.c.l.b16 %v809_v31 }
 0x19f   : > { %v793_v38 = vadd.f32 %v792_v30, %v791_v24 }
 0x1a0   : > { %v782_v39 = vrot.slane %v781_v34, 1  ;;  %v796_v40 = vrot.slane %v758_v35, 4  ;;  %v853_v50 = vsel %vm852_vm1, %v845_v42, %v844_v46 }
 0x1a1   : > { %v794_v43 = vrot.slane %v793_v38, 1  ;;  %v855_v57 = vsel %vm854_vm2, %v846_v49, %v853_v50 }
 0x1a2   : > { %v783_v45 = vadd.f32 %v782_v39, %v781_v34  ;;  %v797_v33 = vadd.f32 %v796_v40, %v758_v35 }
 0x1a3   : > { %v795_v51 = vadd.f32 %v794_v43, %v793_v38 }
 0x1a4   : > { %v811_v47 = vpack.c.bf16 %v783_v45, %v783_v45  ;;  %v798_v48 = vrot.slane %v797_v33, 2 }
 0x1a5   : > { %v813_v58 = vpack.c.bf16 %v795_v51, %v795_v51 }
 0x1a6   : > { %v847_v53 = vunpack.c.l.b16 %v811_v47  ;;  %v799_v54 = vadd.f32 %v798_v48, %v797_v33 }
 0x1a7   : > { %v849_v1 = vunpack.c.l.b16 %v813_v58 }
 0x1a8   : > { %v800_v56 = vrot.slane %v799_v54, 1  ;;  %v857_v59 = vsel %vm856_vm3, %v847_v53, %v855_v57 }
 0x1a9   : > { %v859_v0 = vsel %vm858_vm4, %v848_v60, %v857_v59 }
 0x1aa   : > { %v801_v61 = vadd.f32 %v800_v56, %v799_v54  ;;  %v861_v4 = vsel %vm860_vm5, %v849_v1, %v859_v0 }
 0x1ac   : > { %v814_v63 = vpack.c.bf16 %v801_v61, %v801_v61 }
 0x1ae   : > { %v850_v2 = vunpack.c.l.b16 %v814_v63 }
 0x1b0   : > { %v863_v5 = vsel %vm862_vm6, %v850_v2, %v861_v4 }
 0x1b1   : > { %v865_v6 = vsel %vm864_vm7, %v851_v3, %v863_v5 }
 0x1b2   : > { %v866_v7 = vpack.c.b16 %v865_v6, %v865_v6 }
 0x1b4   : > { %924 = vmatmul.bf16.vlgmr.msra.gmra.mxu2 %v866_v7 }
 0x237   : > { %v925_v11 = vpop.f32.mrf.mxu2 }
 0x238   : > { %v926_v13 = vadd.f32 %v1230_v8, %v925_v11 }
 0x23a   : > { %929 = vst [vmem:[%s330_s12] sm:$0xff] %v926_v13 }
 0x23b   : > { %1304 = shalt.err (!%p1301_p8)
}
 0x23c   : > { %1166 = dma.vmem_to_hbm [thread:$0]  (%p1434_p5), %s944_s9, 128, %s946_s13, %s931_s17  }
 0x23f   : > { %v927_v14 = vpop.f32.mrf.mxu2 }
 0x240 PF: > { %p1178_p9 = scmp.ge.s32.totalorder %s1343_s30, 2  ;;  %s957_s19 = sand.u32 1, %s1331_s27  }
 0x241   : > { %s958_s23 = scalar_lea.sflag [#allocation4], %s957_s19 }
 0x242   : > { %p1173_p10 = pnand %p1178_p9, %p1438_p6 }
 0x244   : > { %p1174_p11 = pneg %p1173_p10 }
 0x246   : > { %1326 = dma.done.wait (%p1174_p11), %s958_s23, 128  }
 0x247   : > { %1328 = vsyncadd (%p1174_p11), %s958_s23, 4294967168  ;;  %p19_p12 = scmp.ge.s32.totalorder %s1421_s11, 4   ;;  %s1670_s27 = smov %s1335_s28 }
 0x248   : > { %s1671_s28 = smov %s1339_s29  ;;  %s1672_s29 = smov %s1432_s14 }
 0x249   : > { %s1673_s30 = smov %s1421_s11  ;;  %21 = sbr.rel (!%p19_p12) target bundleno = 4 (0x4), region = 95 }
 0x24e   :  { %964 = vsyncpa [#allocation3], 1 }
 0x24f   :  { %966 = vsyncpa [#allocation3 + $0x1], 1 }
 0x250   :  { %967 = vsyncpa [#allocation4], 1 }
 0x251   :  { %969 = vsyncpa [#allocation4 + $0x1], 1 }

// kernel: tpu_custom_call.1
= control target key start
LH: loop header
LB: loop body
LE: loop exit
PB: predicated region body
PF: predicated region fallthrough
CT: control target
= control target key end

     0   :  { %13 = vsyncpa [#allocation3], 0  ;;  %s1659_s0 = inlined_call_operand.vmem [shape: s32[16,1,2], index: 0, kind: input, shape index: {}]   ;;  %s1660_s1 = inlined_call_operand.vmem [shape: bf16[128,32], index: 1, kind: input, shape index: {}]   ;;  %s1661_s2 = inlined_call_operand.vmem [shape: bf16[32,128], index: 2, kind: input, shape index: {}]   ;;  %s1662_s3 = inlined_call_operand.vmem [shape: f32[1,128], index: 3, kind: input, shape index: {}]   ;;  %s1663_s4 = inlined_call_operand.vmem [shape: bf16[128,128], index: 4, kind: input, shape index: {}]   ;;  %s1664_s5 = inlined_call_operand.vmem [shape: f32[1,128], index: 5, kind: input, shape index: {}]   ;;  %s1665_s6 = inlined_call_operand.hbm [shape: bf16[128,128], index: 6, kind: input, shape index: {}]   ;;  %s1666_s7 = inlined_call_operand.vmem [shape: f32[1,128], index: 7, kind: input, shape index: {}]   ;;  %s1667_s8 = inlined_call_operand.hbm [shape: f32[16,128], index: 8, kind: output, shape index: {}]  }
   0x1   :  { %14 = vsyncpa [#allocation4], 0 }
   0x2   :  { %16 = vsyncpa [#allocation4 + $0x1], 0  ;;  %s1396_s27 = smov 0   ;;  %s1398_s28 = smov 0  }
   0x3   :  { %s1400_s29 = smov 0   ;;  %s1402_s30 = smov 0  }
   0x4 LB: > { %s1417_s9 = sadd.s32 4294967295, %s1343_s30   ;;  %s1026_s10 = sadd.s32 4294967294, %s1343_s30   ;;  %s1343_s30 = sphi %s1402_s30, %s1673_s30   ;;  %s1339_s29 = sphi %s1400_s29, %s1672_s29   ;;  %s1335_s28 = sphi %s1398_s28, %s1671_s28   ;;  %s1331_s27 = sphi %s1396_s27, %s1670_s27  }
   0x5   : > { %s1421_s11 = sadd.s32 1, %s1343_s30   ;;  %s207_s12 = sadd.s32 1, %s1339_s29 }
   0x6   : > { %s204_s13 = ssub.s32 %s1343_s30, %s1421_s11  ;;  %p217_p0 = scmp.ne.s32.totalorder %s1339_s29, %s1335_s28 }
   0x7   : > { %p205_p1 = scmp.eq.s32.totalorder %s204_s13, 0  ;;  %p218_p2 = scmp.eq.s32.totalorder %s1417_s9, 1 }
   0x8   : > { %p223_p3 = scmp.ne.s32.totalorder %s1335_s28, %s1331_s27  ;;  %p224_p4 = scmp.eq.s32.totalorder %s1026_s10, 1 }
   0x9   : > { %s1432_s14 = scalar_select %p205_p1, %s1339_s29, %s207_s12  }
   0xa   : > { %p1434_p5 = por %p218_p2, %p217_p0  ;;  %p1438_p6 = por %p224_p4, %p223_p3 }
   0xb   : > { %p1027_p7 = scmp.ge.s32.totalorder %s1343_s30, 1  ;;  %p231_p8 = scmp.lt.s32.totalorder %s1343_s30, 3 }
   0xc   : > { %p1176_p9 = scmp.eq.s32.totalorder %s1417_s9, 0  ;;  %s254_s19 = sshll.u32 %s1665_s6, 4  ;;  %s255_s19 = int_to_ptr.hbm [resolvable:$true] %s254_s19 }
   0xd   : > { %p232_p10 = pnand %p1027_p7, %p231_p8  ;;  %s1345_s20 = smov [#allocation2]  }
   0xe   : > { %s256_s21 = sshll.u32 %s1345_s20, 4  ;;  %s1346_s22 = smov 64   ;;  %s257_s21 = int_to_ptr.vmem [resolvable:$true] %s256_s21 }
   0xf   : > { %p1168_p11 = pneg %p232_p10  ;;  %s1347_s23 = smov 4  }
  0x10   : > { %292 = sbr.rel (%p232_p10) target bundleno = 576 (0x240), region = 52 }
  0x11   : > { %p1169_p12 = pnand %p1176_p9, %p1168_p11 }
  0x13   : > { %1171 = dma.hbm_to_vmem [thread:$0]  (!%p1169_p12), %s255_s19, 1024, %s257_s21, [#allocation3], %s1346_s22, %s1346_s22, %s1347_s23  }
  0x15   : > { %1322 = dma.done.wait (%p1176_p9), [#allocation3], 1024  }
  0x16   : > { %1324 = vsyncadd (%p1176_p9), [#allocation3], 4294966272  ;;  %s1455_s24 = sshll.u32 %s1417_s9, 3  ;;  %s1348_s9 = smov 1   ;;  %v1137_v2 = vld [vmem:[%s1661_s2 + $0x8] sm:$0xff]  ;;  %v1136_v6 = vld [vmem:[%s1661_s2] sm:$0xff]  ;;  %v550_v13 = vlaneseq }
  0x17   : > { %p332_p13 = scmp.lt.s32.totalorder %s1455_s24, 15  ;;  %410 = vmatpush.bf16.msra.mxu0 %v1137_v2  ;;  %vm391_vm0 = vcmask 261120   ;;  %v1349_v14 = vmov 0   ;;  %v1145_v36 = vld [vmem:[%s1663_s4 + $0x38] sm:$0xff]  ;;  %v1144_v39 = vld [vmem:[%s1663_s4 + $0x30] sm:$0xff]  ;;  %v1143_v49 = vld [vmem:[%s1663_s4 + $0x28] sm:$0xff] }
  0x18   : > { %1217 = vset.pattern.permute.xlu0 %v1349_v14  ;;  %1219 = vset.pattern.permute.xlu2 %v1349_v14  ;;  %v1510_v15 = vshrl.u32 %v550_v13, 7  ;;  %v1142_v53 = vld [vmem:[%s1663_s4 + $0x20] sm:$0xff]  ;;  %v1141_v62 = vld [vmem:[%s1663_s4 + $0x18] sm:$0xff]  ;;  %s328_s19 = sand.u32 1, %s1335_s28   ;;  %s1297_s22 = scalar_lea.hbm %s1667_s8, 16 }
  0x19   : > { %s333_s25 = scalar_select %p332_p13, %s1455_s24, 15  ;;  %1218 = vset.pattern.permute.xlu1 %v1349_v14  ;;  %513 = vmatpush.bf16.msra.mxu1 %v1145_v36 }
  0x1a   : > { %1154 = vmatpush.bf16.msra.mxu3 %v1145_v36  ;;  %s1032_s20 = sshll.u32 %s328_s19, 3  ;;  %s931_s17 = scalar_lea.sflag [#allocation4], %s328_s19 }
  0x1b   : > { %s1462_s12 = scalar_lea.vmem %s1659_s0, %s333_s25  ;;  %s1035_s18 = sshll.u32 %s333_s25, 2  ;;  %411 = vmatpush.bf16.msra.mxu0 %v1136_v6 }
  0x1c   : > { %v1465_v0 = vld [vmem:[%s1462_s12] sm:$0x1]  ;;  %v1468_v1 = vld [vmem:[%s1462_s12 + $0x2] sm:$0x1]  ;;  %v1476_v3 = vld [vmem:[%s1462_s12 + $0x4] sm:$0x1]  ;;  %s340_s23 = scalar_lea.vmem %s1660_s1, %s1035_s18 }
  0x1d   : > { %552 = vrot.lane.b32.xlu0 %v1465_v0, %s1348_s9  ;;  %556 = vrot.lane.b32.xlu1 %v1468_v1, %s1348_s9  ;;  %v1480_v4 = vld [vmem:[%s1462_s12 + $0x1] sm:$0x1]  ;;  %v1483_v5 = vld [vmem:[%s1462_s12 + $0x3] sm:$0x1]  ;;  %s1350_s25 = smov 127  }
  0x1e   : > { %560 = vrot.lane.b32.xlu2 %v1476_v3, %s1348_s9  ;;  %v1132_v7 = vld [vmem:[%s340_s23] sm:$0xff]  ;;  %v1133_v11 = vld [vmem:[%s340_s23 + $0x8] sm:$0xff]  ;;  %v1134_v17 = vld [vmem:[%s340_s23 + $0x10] sm:$0xff]  ;;  %514 = vmatpush.bf16.msra.mxu1 %v1144_v39 }
  0x1f   : > { %v1494_v8 = vld [vmem:[%s1462_s12 + $0x5] sm:$0x1]  ;;  %1060 = vmatmul.msk.bf16.vlgmr.msra.gmra.mxu0 %vm391_vm0, %v1132_v7  ;;  %v1499_v9 = vld [vmem:[%s1462_s12 + $0x6] sm:$0x1]  ;;  %v1502_v10 = vld [vmem:[%s1462_s12 + $0x7] sm:$0x1]  ;;  %1155 = vmatpush.bf16.msra.mxu3 %v1144_v39 }
  0x20   : > { %v1507_v12 = vld [vmem:[%s1462_s12 + $0x1] ss:$0 sm:$0xff]  ;;  %v1135_v18 = vld [vmem:[%s340_s23 + $0x18] sm:$0xff]  ;;  %v1518_v19 = vld [vmem:[%s1462_s12] ss:$0 sm:$0xff]  ;;  %s941_s23 = scalar_lea.hbm %s1667_s8, %s1455_s24 }
  0x21   : > { %vm617_vm1 = vcmp.lt.s32.totalorder %v1510_v15, %v1507_v12  ;;  %vm616_vm2 = vcmp.lt.s32.totalorder %v1510_v15, %v1518_v19  ;;  %v1523_v21 = vld [vmem:[%s1462_s12 + $0x2] ss:$0 sm:$0xff]  ;;  %v1526_v22 = vld [vmem:[%s1462_s12 + $0x6] ss:$0 sm:$0xff]  ;;  %v1530_v23 = vld [vmem:[%s1462_s12 + $0x3] ss:$0 sm:$0xff]  ;;  %vm608_vm10 = vcmp.ge.s32.totalorder %v1510_v15, %v1518_v19  ;;  %vm609_vm13 = vcmp.ge.s32.totalorder %v1510_v15, %v1507_v12 }
  0x22   : > { %v625_v16 = vsel %vm617_vm1, 1, %v1349_v14  ;;  %v624_v20 = vsel %vm616_vm2, 1, %v1349_v14  ;;  %vm618_vm3 = vcmp.lt.s32.totalorder %v1510_v15, %v1523_v21  ;;  %vm622_vm4 = vcmp.lt.s32.totalorder %v1510_v15, %v1526_v22  ;;  %v1541_v27 = vld [vmem:[%s1462_s12 + $0x5] ss:$0 sm:$0xff]  ;;  %v1545_v28 = vld [vmem:[%s1462_s12 + $0x4] ss:$0 sm:$0xff]  ;;  %515 = vmatpush.bf16.msra.mxu1 %v1143_v49 }
  0x23   : > { %v626_v24 = vsel %vm618_vm3, 1, %v1349_v14  ;;  %v630_v25 = vsel %vm622_vm4, 1, %v1349_v14  ;;  %vm619_vm5 = vcmp.lt.s32.totalorder %v1510_v15, %v1530_v23  ;;  %vm621_vm6 = vcmp.lt.s32.totalorder %v1510_v15, %v1541_v27  ;;  %v1554_v31 = vld [vmem:[%s1462_s12 + $0x7] ss:$0 sm:$0xff]  ;;  %1156 = vmatpush.bf16.msra.mxu3 %v1143_v49  ;;  %s330_s12 = scalar_lea.vmem [#allocation5], %s1032_s20  ;;  %s945_s13 = sshll.u32 %s941_s23, 4  ;;  %s946_s13 = int_to_ptr.hbm [resolvable:$true] %s945_s13 }
  0x24   : > { %v627_v26 = vsel %vm619_vm5, 1, %v1349_v14  ;;  %v629_v29 = vsel %vm621_vm6, 1, %v1349_v14  ;;  %vm620_vm7 = vcmp.lt.s32.totalorder %v1510_v15, %v1545_v28  ;;  %vm623_vm8 = vcmp.lt.s32.totalorder %v1510_v15, %v1554_v31 }
  0x25   : > { %554 = vrot.lane.b32.xlu0 %v1480_v4, %s1348_s9  ;;  %558 = vrot.lane.b32.xlu1 %v1483_v5, %s1348_s9  ;;  %v628_v30 = vsel %vm620_vm7, 1, %v1349_v14  ;;  %v631_v32 = vsel %vm623_vm8, 1, %v1349_v14  ;;  %vm610_vm15 = vcmp.ge.s32.totalorder %v1510_v15, %v1523_v21  ;;  %vm611_vm3 = vcmp.ge.s32.totalorder %v1510_v15, %v1530_v23 }
  0x26   : > { %562 = vrot.lane.b32.xlu2 %v1494_v8, %s1348_s9  ;;  %516 = vmatpush.bf16.msra.mxu1 %v1142_v53  ;;  %vm612_vm5 = vcmp.ge.s32.totalorder %v1510_v15, %v1545_v28  ;;  %vm613_vm7 = vcmp.ge.s32.totalorder %v1510_v15, %v1541_v27 }
  0x27   : > { %1157 = vmatpush.bf16.msra.mxu3 %v1142_v53 }
  0x2a   : > { %517 = vmatpush.bf16.msra.mxu1 %v1141_v62 }
  0x2b   : > { %1158 = vmatpush.bf16.msra.mxu3 %v1141_v62 }
  0x2d   : > { %564 = vrot.lane.b32.xlu0 %v1499_v9, %s1348_s9  ;;  %566 = vrot.lane.b32.xlu1 %v1502_v10, %s1348_s9  ;;  %s943_s9 = sshll.u32 %s330_s12, 4  ;;  %s944_s9 = int_to_ptr.vmem [resolvable:$true] %s943_s9 }
  0x2e   : > { %632 = vrot.lane.b32.xlu2 %v624_v20, %s1350_s25 }
  0x2f   : > { %1061 = vmatmul.msk.bf16.gmra.mxu0 %vm391_vm0, %v1133_v11 }
  0x35   : > { %634 = vrot.lane.b32.xlu0 %v625_v16, %s1350_s25  ;;  %636 = vrot.lane.b32.xlu1 %v626_v24, %s1350_s25  ;;  %v1228_v24 = vld [vmem:[%s1662_s3] ss:$0 sm:$0xff] }
  0x36   : > { %638 = vrot.lane.b32.xlu2 %v627_v26, %s1350_s25  ;;  %v1138_v26 = vld [vmem:[%s1663_s4] sm:$0xff] }
  0x3d   : > { %644 = vrot.lane.b32.xlu0 %v630_v25, %s1350_s25  ;;  %642 = vrot.lane.b32.xlu1 %v629_v29, %s1350_s25 }
  0x3e   : > { %640 = vrot.lane.b32.xlu2 %v628_v30, %s1350_s25 }
  0x3f   : > { %1062 = vmatmul.msk.bf16.gmra.mxu0 %vm391_vm0, %v1134_v17 }
  0x46   : > { %646 = vrot.lane.b32.xlu2 %v631_v32, %s1350_s25 }
  0x4f   : > { %1063 = vmatmul.msk.bf16.gmra.mxu0 %vm391_vm0, %v1135_v18 }
  0x78   : > { %v561_v33 = vpop.permute.xlu2 %560 }
  0x79   : > { %v572_v44 = vsub.s32 %v1476_v3, %v561_v33 }
  0x7b   : > { %v580_v52 = vcvt.s32.f32 %v572_v44 }
  0x7d   : > { %v588_v61 = vmax.f32 %v580_v52, 1.0 }
  0x80   : > { %v563_v42 = vpop.permute.xlu2 %562 }
  0x81   : > { %v573_v46 = vsub.s32 %v1494_v8, %v563_v42 }
  0x83   : > { %v581_v55 = vcvt.s32.f32 %v573_v46 }
  0x85   : > { %v589_v63 = vmax.f32 %v581_v55, 1.0 }
  0x8f   : > { %v553_v34 = vpop.permute.xlu0 %552  ;;  %v557_v35 = vpop.permute.xlu1 %556 }
  0x90   : > { %v568_v37 = vsub.s32 %v1465_v0, %v553_v34  ;;  %v570_v38 = vsub.s32 %v1468_v1, %v557_v35 }
  0x92   : > { %v576_v40 = vcvt.s32.f32 %v568_v37  ;;  %v578_v41 = vcvt.s32.f32 %v570_v38 }
  0x94   : > { %v584_v43 = vmax.f32 %v576_v40, 1.0  ;;  %v586_v45 = vmax.f32 %v578_v41, 1.0 }
  0x96   : > { %1231 = vrcp.f32 %v584_v43 }
  0x97   : > { %v555_v47 = vpop.permute.xlu0 %554  ;;  %v559_v48 = vpop.permute.xlu1 %558  ;;  %1233 = vrcp.f32 %v586_v45 }
  0x98   : > { %v569_v50 = vsub.s32 %v1480_v4, %v555_v47  ;;  %v571_v51 = vsub.s32 %v1483_v5, %v559_v48  ;;  %v1140_v5 = vld [vmem:[%s1663_s4 + $0x10] sm:$0xff] }
  0x99   : > { %518 = vmatpush.bf16.msra.mxu1 %v1140_v5  ;;  %1159 = vmatpush.bf16.msra.mxu3 %v1140_v5 }
  0x9a   : > { %v577_v54 = vcvt.s32.f32 %v569_v50  ;;  %v579_v56 = vcvt.s32.f32 %v571_v51 }
  0x9c   : > { %v1232_v57 = vpop.eup %1231  ;;  %v585_v58 = vmax.f32 %v577_v54, 1.0  ;;  %v587_v59 = vmax.f32 %v579_v56, 1.0  ;;  %v413_v18 = vpop.f32.mrf.mxu0 }
  0x9d   : > { %v672_v60 = vperm.slane %v1232_v57, 0  ;;  %v1234_v2 = vpop.eup %1233  ;;  %v414_v32 = vadd.f32 %v1228_v24, %v413_v18 }
  0x9e   : > { %1235 = vrcp.f32 %v585_v58  ;;  %v674_v8 = vperm.slane %v1234_v2, 0 }
  0x9f   : > { %680 = vrot.lane.b32.xlu0 %v672_v60, %s1350_s25  ;;  %1237 = vrcp.f32 %v587_v59  ;;  %v565_v0 = vpop.permute.xlu0 %564  ;;  %v567_v1 = vpop.permute.xlu1 %566  ;;  %v433_v36 = vmax.f32 %v414_v32, 0.0  ;;  %v1151_v32 = vld [vmem:[#allocation2 + $0x28] sm:$0xff] }
  0xa0   : > { %v574_v3 = vsub.s32 %v1499_v9, %v565_v0  ;;  %v575_v4 = vsub.s32 %v1502_v10, %v567_v1  ;;  %1239 = vrcp.f32 %v588_v61  ;;  %v1139_v9 = vld [vmem:[%s1663_s4 + $0x8] sm:$0xff] }
  0xa1   : > { %1241 = vrcp.f32 %v589_v63  ;;  %519 = vmatpush.bf16.msra.mxu1 %v1139_v9  ;;  %1160 = vmatpush.bf16.msra.mxu3 %v1139_v9  ;;  %v633_v63 = vpop.permute.xlu2 %632 }
  0xa2   : > { %v582_v6 = vcvt.s32.f32 %v574_v3  ;;  %v583_v7 = vcvt.s32.f32 %v575_v4  ;;  %vm648_vm9 = vcmp.ne.s32.totalorder %v633_v63, 0 }
  0xa3   : > { %vm656_vm11 = vmand %vm608_vm10, %vm648_vm9 }
  0xa4   : > { %v1236_v11 = vpop.eup %1235  ;;  %v591_v13 = vmax.f32 %v583_v7, 1.0  ;;  %v590_v17 = vmax.f32 %v582_v6, 1.0  ;;  %v415_v35 = vpop.f32.mrf.mxu0 }
  0xa5   : > { %v1238_v14 = vpop.eup %1237  ;;  %v673_v16 = vperm.slane %v1236_v11, 0  ;;  %520 = vmatpush.bf16.msra.mxu1 %v1138_v26  ;;  %1161 = vmatpush.bf16.msra.mxu3 %v1138_v26  ;;  %v416_v37 = vadd.f32 %v1228_v24, %v415_v35  ;;  %v1153_v26 = vld [vmem:[#allocation2 + $0x38] sm:$0xff] }
  0xa6   : > { %v675_v10 = vperm.slane %v1238_v14, 0  ;;  %v1240_v20 = vpop.eup %1239  ;;  %1243 = vrcp.f32 %v591_v13  ;;  %916 = vmatpush.bf16.msra.mxu2 %v1153_v26 }
  0xa7   : > { %684 = vrot.lane.b32.xlu0 %v674_v8, %s1350_s25  ;;  %682 = vrot.lane.b32.xlu1 %v673_v16, %s1350_s25  ;;  %v1242_v25 = vpop.eup %1241  ;;  %1245 = vrcp.f32 %v590_v17  ;;  %v676_v29 = vperm.slane %v1240_v20, 0  ;;  %v434_v39 = vmax.f32 %v416_v37, 0.0  ;;  %v635_v0 = vpop.permute.xlu0 %634 }
  0xa8   : > { %686 = vrot.lane.b32.xlu2 %v675_v10, %s1350_s25  ;;  %v677_v30 = vperm.slane %v1242_v25, 0  ;;  %v637_v2 = vpop.permute.xlu1 %636  ;;  %vm649_vm12 = vcmp.ne.s32.totalorder %v635_v0, 0 }
  0xa9   : > { %v441_v41 = vpack.c.bf16 %v434_v39, %v433_v36  ;;  %v639_v1 = vpop.permute.xlu2 %638  ;;  %vm650_vm14 = vcmp.ne.s32.totalorder %v637_v2, 0  ;;  %vm657_vm0 = vmand %vm609_vm13, %vm649_vm12  ;;  %vm615_vm12 = vcmp.ge.s32.totalorder %v1510_v15, %v1554_v31 }
  0xaa   : > { %vm658_vm1 = vmand %vm610_vm15, %vm650_vm14  ;;  %vm651_vm2 = vcmp.ne.s32.totalorder %v639_v1, 0  ;;  %vm614_vm14 = vcmp.ge.s32.totalorder %v1510_v15, %v1526_v22  ;;  %v1229_v15 = vld [vmem:[%s1664_s5] ss:$0 sm:$0xff] }
  0xab   : > { %521 = vmatmul.bf16.vlgmr.msra.gmra.mxu1 %v441_v41  ;;  %vm659_vm8 = vmand %vm611_vm3, %vm651_vm2  ;;  %v1150_v22 = vld [vmem:[#allocation2 + $0x20] sm:$0xff]  ;;  %vm854_vm2 = vcmask 1042434   ;;  %vm856_vm3 = vcmask 1043459  }
  0xac   : > { %v1244_v33 = vpop.eup %1243  ;;  %v418_v42 = vpop.f32.mrf.mxu0 }
  0xad   : > { %v679_v34 = vperm.slane %v1244_v33, 0  ;;  %v1246_v38 = vpop.eup %1245  ;;  %v419_v43 = vadd.f32 %v1228_v24, %v418_v42 }
  0xae   : > { %v678_v40 = vperm.slane %v1246_v38, 0  ;;  %v1149_v38 = vld [vmem:[#allocation2 + $0x18] sm:$0xff] }
  0xaf   : > { %690 = vrot.lane.b32.xlu0 %v677_v30, %s1350_s25  ;;  %688 = vrot.lane.b32.xlu1 %v676_v29, %s1350_s25  ;;  %v435_v45 = vmax.f32 %v419_v43, 0.0  ;;  %v645_v3 = vpop.permute.xlu0 %644  ;;  %v1152_v30 = vld [vmem:[#allocation2 + $0x30] sm:$0xff] }
  0xb0   : > { %694 = vrot.lane.b32.xlu2 %v679_v34, %s1350_s25  ;;  %v643_v5 = vpop.permute.xlu1 %642  ;;  %vm654_vm13 = vcmp.ne.s32.totalorder %v645_v3, 0  ;;  %917 = vmatpush.bf16.msra.mxu2 %v1152_v30 }
  0xb1   : > { %v641_v4 = vpop.permute.xlu2 %640  ;;  %vm653_vm6 = vcmp.ne.s32.totalorder %v643_v5, 0 }
  0xb2   : > { %vm652_vm4 = vcmp.ne.s32.totalorder %v641_v4, 0  ;;  %vm661_vm10 = vmand %vm613_vm7, %vm653_vm6  ;;  %vm862_vm6 = vcmask 1046534   ;;  %vm864_vm7 = vcmask 1047559  }
  0xb3   : > { %vm660_vm9 = vmand %vm612_vm5, %vm652_vm4  ;;  %vm858_vm4 = vcmask 1044484   ;;  %vm860_vm5 = vcmask 1045509  }
  0xb4   : > { %v420_v44 = vpop.f32.mrf.mxu0  ;;  %918 = vmatpush.bf16.msra.mxu2 %v1151_v32 }
  0xb5   : > { %v421_v46 = vadd.f32 %v1228_v24, %v420_v44 }
  0xb7   : > { %692 = vrot.lane.b32.xlu1 %v678_v40, %s1350_s25  ;;  %v436_v47 = vmax.f32 %v421_v46, 0.0  ;;  %s1291_s25 = sshra.s32 %s946_s13, 4  ;;  %s1292_s25 = int_to_ptr.hbm [resolvable:$true] %s1291_s25 }
  0xb8   : > { %919 = vmatpush.bf16.msra.mxu2 %v1150_v22  ;;  %s1293_s18 = scalar_lea.hbm %s1292_s25, 8  ;;  %p1298_p3 = scmp.lt.s32.totalorder %s1292_s25, %s1667_s8 }
  0xb9   : > { %v442_v48 = vpack.c.bf16 %v436_v47, %v435_v45  ;;  %v647_v8 = vpop.permute.xlu2 %646  ;;  %v1148_v45 = vld [vmem:[#allocation2 + $0x10] sm:$0xff]  ;;  %p1294_p0 = scmp.ne.s32.totalorder %s1292_s25, %s1293_s18  ;;  %p1299_p4 = scmp.lt.s32.totalorder %s1297_s22, %s1293_s18 }
  0xbb   : > { %526 = vmatmul.bf16.gmra.mxu1 %v442_v48  ;;  %p1295_p1 = pnand %p1294_p0, %p1434_p5  ;;  %p1300_p7 = por %p1299_p4, %p1298_p3 }
  0xbc   : > { %v423_v49 = vpop.f32.mrf.mxu0  ;;  %920 = vmatpush.bf16.msra.mxu2 %v1149_v38 }
  0xbd   : > { %v424_v50 = vadd.f32 %v1228_v24, %v423_v49  ;;  %p1296_p2 = pneg %p1295_p1 }
  0xbf   : > { %v437_v52 = vmax.f32 %v424_v50, 0.0  ;;  %p1301_p8 = pnand %p1300_p7, %p1296_p2 }
  0xc0   : > { %921 = vmatpush.bf16.msra.mxu2 %v1148_v45 }
  0xc4   : > { %v425_v51 = vpop.f32.mrf.mxu0 }
  0xc5   : > { %v426_v53 = vadd.f32 %v1228_v24, %v425_v51 }
  0xc7   : > { %v438_v54 = vmax.f32 %v426_v53, 0.0 }
  0xc9   : > { %v443_v55 = vpack.c.bf16 %v438_v54, %v437_v52  ;;  %v1147_v52 = vld [vmem:[#allocation2 + $0x8] sm:$0xff] }
  0xca   : > { %922 = vmatpush.bf16.msra.mxu2 %v1147_v52 }
  0xcb   : > { %531 = vmatmul.bf16.vlgmr.msra.gmra.mxu3 %v443_v55 }
  0xcc   : > { %v428_v56 = vpop.f32.mrf.mxu0 }
  0xcd   : > { %v429_v57 = vadd.f32 %v1228_v24, %v428_v56 }
  0xcf   : > { %v439_v59 = vmax.f32 %v429_v57, 0.0  ;;  %v1146_v57 = vld [vmem:[#allocation2] sm:$0xff] }
  0xd0   : > { %923 = vmatpush.bf16.msra.mxu2 %v1146_v57 }
  0xd4   : > { %v430_v58 = vpop.f32.mrf.mxu0 }
  0xd5   : > { %v431_v60 = vadd.f32 %v1228_v24, %v430_v58 }
  0xd7   : > { %v440_v61 = vmax.f32 %v431_v60, 0.0 }
  0xd9   : > { %v444_v62 = vpack.c.bf16 %v440_v61, %v439_v59 }
  0xdb   : > { %536 = vmatmul.bf16.gmra.mxu3 %v444_v62 }
 0x102   : > { %v687_v12 = vpop.permute.xlu2 %686 }
 0x103   : > { %v707_v9 = vsel %vm659_vm8, %v687_v12, 0.0 }
 0x10a   : > { %v695_v23 = vpop.permute.xlu2 %694 }
 0x111   : > { %v681_v6 = vpop.permute.xlu0 %680 }
 0x112   : > { %v704_v7 = vsel %vm656_vm11, %v681_v6, 0.0  ;;  %vm655_vm11 = vcmp.ne.s32.totalorder %v647_v8, 0 }
 0x113   : > { %714 = vperm.xlu0 %1217, %v704_v7   ;;  %vm663_vm15 = vmand %vm615_vm12, %vm655_vm11 }
 0x114   : > { %v711_v28 = vsel %vm663_vm15, %v695_v23, 0.0 }
 0x119   : > { %v683_v11 = vpop.permute.xlu1 %682  ;;  %v685_v13 = vpop.permute.xlu0 %684 }
 0x11a   : > { %v705_v14 = vsel %vm657_vm0, %v683_v11, 0.0  ;;  %v706_v19 = vsel %vm658_vm1, %v685_v13, 0.0  ;;  %vm662_vm0 = vmand %vm614_vm14, %vm654_vm13  ;;  %vm852_vm1 = vcmask 1041409  }
 0x11b   : > { %719 = vperm.xlu1 %1218, %v705_v14   ;;  %724 = vperm.xlu2 %1219, %v706_v19  }
 0x121   : > { %v689_v21 = vpop.permute.xlu1 %688  ;;  %v691_v16 = vpop.permute.xlu0 %690 }
 0x122   : > { %v708_v10 = vsel %vm660_vm9, %v689_v21, 0.0  ;;  %v709_v17 = vsel %vm661_vm10, %v691_v16, 0.0 }
 0x123   : > { %734 = vperm.xlu2 %1219, %v708_v10   ;;  %729 = vperm.xlu1 %1218, %v707_v9  }
 0x124   : > { %739 = vperm.xlu0 %1217, %v709_v17  }
 0x128   : > { %v522_v24 = vpop.f32.mrf.mxu1 }
 0x129   : > { %v693_v27 = vpop.permute.xlu1 %692  ;;  %v523_v37 = vadd.f32 %v1229_v15, %v522_v24 }
 0x12a   : > { %v710_v18 = vsel %vm662_vm0, %v693_v27, 0.0 }
 0x12b   : > { %744 = vperm.xlu1 %1218, %v710_v18   ;;  %749 = vperm.xlu2 %1219, %v711_v28  }
 0x130   : > { %v524_v29 = vpop.f32.mrf.mxu1 }
 0x131   : > { %v525_v50 = vadd.f32 %v1229_v15, %v524_v29 }
 0x138   : > { %v527_v34 = vpop.f32.mrf.mxu1 }
 0x139   : > { %v528_v36 = vadd.f32 %v1229_v15, %v527_v34 }
 0x140   : > { %v529_v61 = vpop.f32.mrf.mxu1 }
 0x141   : > { %v530_v3 = vadd.f32 %v1229_v15, %v529_v61 }
 0x14e   : > { %v532_v20 = vpop.f32.mrf.mxu3 }
 0x14f   : > { %v533_v41 = vadd.f32 %v1229_v15, %v532_v20 }
 0x156   : > { %v534_v25 = vpop.f32.mrf.mxu3 }
 0x157   : > { %v535_v5 = vadd.f32 %v1229_v15, %v534_v25 }
 0x15e   : > { %v1618_v33 = vpop.f32.mrf.mxu3 }
 0x15f   : > { %v538_v25 = vadd.f32 %v1229_v15, %v1618_v33 }
 0x166   : > { %v539_v43 = vpop.f32.mrf.mxu3 }
 0x167   : > { %v540_v48 = vadd.f32 %v1229_v15, %v539_v43 }
 0x175   : > { %v725_v31 = vpop.permute.xlu2 %724 }
 0x176   : > { %v754_v39 = vmul.f32 %v725_v31, %v528_v36 }
 0x178   : > { %v772_v46 = vrot.slane %v754_v39, 4 }
 0x17a   : > { %v773_v53 = vadd.f32 %v772_v46, %v754_v39 }
 0x17c   : > { %v774_v62 = vrot.slane %v773_v53, 2 }
 0x17d   : > { %v735_v35 = vpop.permute.xlu2 %734 }
 0x17e   : > { %v756_v47 = vmul.f32 %v735_v35, %v533_v41  ;;  %v775_v6 = vadd.f32 %v774_v62, %v773_v53 }
 0x180   : > { %v784_v55 = vrot.slane %v756_v47, 4  ;;  %v776_v10 = vrot.slane %v775_v6, 1 }
 0x182   : > { %v785_v63 = vadd.f32 %v784_v55, %v756_v47  ;;  %v777_v29 = vadd.f32 %v776_v10, %v775_v6 }
 0x184   : > { %v786_v8 = vrot.slane %v785_v63, 2  ;;  %v810_v41 = vpack.c.bf16 %v777_v29, %v777_v29 }
 0x185   : > { %v715_v40 = vpop.permute.xlu0 %714  ;;  %v750_v51 = vpop.permute.xlu2 %749 }
 0x186   : > { %v752_v42 = vmul.f32 %v715_v40, %v523_v37  ;;  %v759_v58 = vmul.f32 %v750_v51, %v540_v48  ;;  %v787_v23 = vadd.f32 %v786_v8, %v785_v63  ;;  %v1230_v8 = vld [vmem:[%s1666_s7] ss:$0 sm:$0xff] }
 0x188   : > { %v760_v44 = vrot.slane %v752_v42, 4  ;;  %v802_v1 = vrot.slane %v759_v58, 4  ;;  %v788_v22 = vrot.slane %v787_v23, 1 }
 0x18a   : > { %v761_v49 = vadd.f32 %v760_v44, %v752_v42  ;;  %v803_v19 = vadd.f32 %v802_v1, %v759_v58  ;;  %v789_v44 = vadd.f32 %v788_v22, %v787_v23 }
 0x18c   : > { %v762_v59 = vrot.slane %v761_v49, 2  ;;  %v804_v18 = vrot.slane %v803_v19, 2  ;;  %v812_v52 = vpack.c.bf16 %v789_v44, %v789_v44 }
 0x18d   : > { %v720_v54 = vpop.permute.xlu1 %719 }
 0x18e   : > { %v753_v56 = vmul.f32 %v720_v54, %v525_v50  ;;  %v763_v2 = vadd.f32 %v762_v59, %v761_v49  ;;  %v805_v36 = vadd.f32 %v804_v18, %v803_v19  ;;  %v846_v49 = vunpack.c.l.b16 %v810_v41 }
 0x190   : > { %v766_v60 = vrot.slane %v753_v56, 4  ;;  %v764_v12 = vrot.slane %v763_v2, 1  ;;  %v806_v15 = vrot.slane %v805_v36, 1 }
 0x192   : > { %v767_v0 = vadd.f32 %v766_v60, %v753_v56  ;;  %v765_v20 = vadd.f32 %v764_v12, %v763_v2  ;;  %v807_v55 = vadd.f32 %v806_v15, %v805_v36  ;;  %v848_v60 = vunpack.c.l.b16 %v812_v52 }
 0x194   : > { %v768_v4 = vrot.slane %v767_v0, 2  ;;  %v808_v37 = vpack.c.bf16 %v765_v20, %v765_v20  ;;  %v815_v62 = vpack.c.bf16 %v807_v55, %v807_v55 }
 0x195   : > { %v730_v7 = vpop.permute.xlu1 %729 }
 0x196   : > { %v769_v11 = vadd.f32 %v768_v4, %v767_v0  ;;  %v755_v13 = vmul.f32 %v730_v7, %v530_v3  ;;  %v740_v14 = vpop.permute.xlu0 %739  ;;  %v844_v46 = vunpack.c.l.b16 %v808_v37  ;;  %v851_v3 = vunpack.c.l.b16 %v815_v62 }
 0x197   : > { %v757_v21 = vmul.f32 %v740_v14, %v535_v5 }
 0x198   : > { %v770_v16 = vrot.slane %v769_v11, 1  ;;  %v778_v9 = vrot.slane %v755_v13, 4 }
 0x199   : > { %v790_v17 = vrot.slane %v757_v21, 4 }
 0x19a   : > { %v771_v27 = vadd.f32 %v770_v16, %v769_v11  ;;  %v779_v28 = vadd.f32 %v778_v9, %v755_v13 }
 0x19b   : > { %v791_v24 = vadd.f32 %v790_v17, %v757_v21 }
 0x19c   : > { %v780_v26 = vrot.slane %v779_v28, 2  ;;  %v809_v31 = vpack.c.bf16 %v771_v27, %v771_v27 }
 0x19d   : > { %v792_v30 = vrot.slane %v791_v24, 2  ;;  %v745_v32 = vpop.permute.xlu1 %744 }
 0x19e   : > { %v781_v34 = vadd.f32 %v780_v26, %v779_v28  ;;  %v758_v35 = vmul.f32 %v745_v32, %v538_v25  ;;  %v845_v42 = vunpack.c.l.b16 %v809_v31 }
 0x19f   : > { %v793_v38 = vadd.f32 %v792_v30, %v791_v24 }
 0x1a0   : > { %v782_v39 = vrot.slane %v781_v34, 1  ;;  %v796_v40 = vrot.slane %v758_v35, 4  ;;  %v853_v50 = vsel %vm852_vm1, %v845_v42, %v844_v46 }
 0x1a1   : > { %v794_v43 = vrot.slane %v793_v38, 1  ;;  %v855_v57 = vsel %vm854_vm2, %v846_v49, %v853_v50 }
 0x1a2   : > { %v783_v45 = vadd.f32 %v782_v39, %v781_v34  ;;  %v797_v33 = vadd.f32 %v796_v40, %v758_v35 }
 0x1a3   : > { %v795_v51 = vadd.f32 %v794_v43, %v793_v38 }
 0x1a4   : > { %v811_v47 = vpack.c.bf16 %v783_v45, %v783_v45  ;;  %v798_v48 = vrot.slane %v797_v33, 2 }
 0x1a5   : > { %v813_v58 = vpack.c.bf16 %v795_v51, %v795_v51 }
 0x1a6   : > { %v847_v53 = vunpack.c.l.b16 %v811_v47  ;;  %v799_v54 = vadd.f32 %v798_v48, %v797_v33 }
 0x1a7   : > { %v849_v1 = vunpack.c.l.b16 %v813_v58 }
 0x1a8   : > { %v800_v56 = vrot.slane %v799_v54, 1  ;;  %v857_v59 = vsel %vm856_vm3, %v847_v53, %v855_v57 }
 0x1a9   : > { %v859_v0 = vsel %vm858_vm4, %v848_v60, %v857_v59 }
 0x1aa   : > { %v801_v61 = vadd.f32 %v800_v56, %v799_v54  ;;  %v861_v4 = vsel %vm860_vm5, %v849_v1, %v859_v0 }
 0x1ac   : > { %v814_v63 = vpack.c.bf16 %v801_v61, %v801_v61 }
 0x1ae   : > { %v850_v2 = vunpack.c.l.b16 %v814_v63 }
 0x1b0   : > { %v863_v5 = vsel %vm862_vm6, %v850_v2, %v861_v4 }
 0x1b1   : > { %v865_v6 = vsel %vm864_vm7, %v851_v3, %v863_v5 }
 0x1b2   : > { %v866_v7 = vpack.c.b16 %v865_v6, %v865_v6 }
 0x1b4   : > { %924 = vmatmul.bf16.vlgmr.msra.gmra.mxu2 %v866_v7 }
 0x237   : > { %v925_v11 = vpop.f32.mrf.mxu2 }
 0x238   : > { %v926_v13 = vadd.f32 %v1230_v8, %v925_v11 }
 0x23a   : > { %929 = vst [vmem:[%s330_s12] sm:$0xff] %v926_v13 }
 0x23b   : > { %1304 = shalt.err (!%p1301_p8)
}
 0x23c   : > { %1166 = dma.vmem_to_hbm [thread:$0]  (%p1434_p5), %s944_s9, 128, %s946_s13, %s931_s17  }
 0x23f   : > { %v927_v14 = vpop.f32.mrf.mxu2 }
 0x240 PF: > { %p1178_p9 = scmp.ge.s32.totalorder %s1343_s30, 2  ;;  %s957_s19 = sand.u32 1, %s1331_s27  }
 0x241   : > { %s958_s23 = scalar_lea.sflag [#allocation4], %s957_s19 }
 0x242   : > { %p1173_p10 = pnand %p1178_p9, %p1438_p6 }
 0x244   : > { %p1174_p11 = pneg %p1173_p10 }
 0x246   : > { %1326 = dma.done.wait (%p1174_p11), %s958_s23, 128  }
 0x247   : > { %1328 = vsyncadd (%p1174_p11), %s958_s23, 4294967168  ;;  %p19_p12 = scmp.ge.s32.totalorder %s1421_s11, 4   ;;  %s1670_s27 = smov %s1335_s28 }
 0x248   : > { %s1671_s28 = smov %s1339_s29  ;;  %s1672_s29 = smov %s1432_s14 }
 0x249   : > { %s1673_s30 = smov %s1421_s11  ;;  %21 = sbr.rel (!%p19_p12) target bundleno = 4 (0x4), region = 95 }
 0x24e   :  { %964 = vsyncpa [#allocation3], 1 }
 0x24f   :  { %966 = vsyncpa [#allocation3 + $0x1], 1 }
 0x250   :  { %967 = vsyncpa [#allocation4], 1 }
 0x251   :  { %969 = vsyncpa [#allocation4 + $0x1], 1 }

</bundles_post_ra>
